<compile_context>
chip_gen: v6e
topology: v6e:2x2x1
jax: 0.10.0
libtpu: 0.0.40
codegen_flags: <defaults>
</compile_context>

<pallas_src>
import jax
import jax.numpy as jnp
from jax.experimental import pallas as pl
from jax.experimental.pallas import tpu as pltpu

HIDDEN_NF = 32
EDGE_FEAT_NF = 2
N_LAYERS = 2
NORM_FACTOR = 100.0
NORM_CONSTANT = 1.0
BN_EPS = 1e-5

VMEM = pl.BlockSpec(memory_space=pltpu.MemorySpace.VMEM)
SMEM = pl.BlockSpec(memory_space=pltpu.MemorySpace.SMEM)


# ------------------------------ fused kernel ---------------------------------

def fused_block_kernel(hT_ref, xT_ref, cdT_ref, eaT_ref, gcr_ref,
                       gWg_ref, gW2_ref, gWn_ref, gWn2_ref, gV_ref,
                       eqWg_ref, eqW2_ref, eqV_ref, ab_ref,
                       hT_out_ref, xT_out_ref):
    f32 = jnp.float32
    H = HIDDEN_NF
    N = hT_ref.shape[1]

    def mm(a, b):
        return jnp.dot(a, b, preferred_element_type=f32)

    def scatter_edges(t_e, gcolT):
        # sum_e t_e[:, e] * [col[e] == n]  ==  t_e @ GcolT^T ; done as an 'NT'
        # dot_general (contract the edge axis of both) so no [E, N] transpose
        # is ever materialized.
        return jax.lax.dot_general(
            t_e, gcolT, dimension_numbers=(((1,), (1,)), ((), ())),
            preferred_element_type=f32)

    def bn(t, gamma, beta):
        # BatchNorm1d (training mode), two-pass stats over the edge axis
        # (lane reduce), f32 on VPU + EUP rsqrt.
        m = jnp.mean(t, axis=1, keepdims=True)
        c = t - m
        v = jnp.mean(c * c, axis=1, keepdims=True)
        return c * jax.lax.rsqrt(v + BN_EPS) * gamma + beta

    hT = hT_ref[...]                               # [H, N]
    ea0 = eaT_ref[0:1, :]                          # [1, E] radial
    ea1 = eaT_ref[1:2, :]                          # [1, E] edge_attr
    Gcr = gcr_ref[...]                             # [2N, E] one-hot (col ; row)
    GcolT = Gcr[:N, :]                             # [N, E]  scatter uses col half

    def edge_pre(hT_cur, Wg, ew0, ew1, bias):
        # cat([h[col], h[row], ea]) @ W1 + b, transposed & restructured:
        #   packed node-side transform (N columns, cheap) -> ONE fused one-hot
        #   gather matmul (K = 2N); the K=2 edge-attr part stays on the VPU.
        hw = mm(Wg, hT_cur)                                        # [2H, N]
        hw2n = jnp.concatenate([hw[:H, :], hw[H:, :]], axis=1)     # [H, 2N]
        return mm(hw2n, Gcr) + ew0 * ea0 + ew1 * ea1 + bias        # [H, E]

    # ---------------- n_layers x GCL (static unroll; N_LAYERS == 2) ----------
    # TODO(synk): switch to lax.fori_loop with dynamic layer indexing if
    # N_LAYERS grows (the unroll is fine at 2).
    for layer in range(N_LAYERS):
        Wg  = gWg_ref[layer]                       # [2H, H]  = [Wc^T ; Wr^T]
        W2  = gW2_ref[layer]                       # [H, H]   = eW2^T
        Wn  = gWn_ref[layer]                       # [H, 2H]  = [nW1h^T | (nW1a/NF)^T]
        Wn2 = gWn2_ref[layer]                      # [H, H]   = nW2^T
        V   = gV_ref[layer]                        # [H, 9]   column-packed vectors
        ew0, ew1 = V[:, 0:1], V[:, 1:2]
        eb1, bng, bnb, eb2 = V[:, 2:3], V[:, 3:4], V[:, 4:5], V[:, 5:6]
        nb1, nb2, aW = V[:, 6:7], V[:, 7:8], V[:, 8:9]
        ab = ab_ref[layer]                         # SMEM scalar (attention bias)

        # edge_mlp: Linear(2H+2, H) -> BatchNorm1d(H) -> Linear(H, H)
        t = bn(edge_pre(hT, Wg, ew0, ew1, eb1), bng, bnb)          # [H, E]
        ef = mm(W2, t) + eb2                                       # [H, E]

        # attention: sigmoid(<edge_feat, aW> + ab) -- VPU mul + sublane reduce
        att = jax.nn.sigmoid(jnp.sum(ef * aW, axis=0, keepdims=True) + ab)
        ef = ef * att

        # scatter-sum over col (1/NORM_FACTOR folded into Wn's agg columns),
        # then fused node_mlp first layer (K = 2H) + residual.
        aggT = scatter_edges(ef, GcolT)                            # [H, N]
        z = jnp.concatenate([hT, aggT], axis=0)                    # [2H, N]
        mT = mm(Wn, z) + nb1                                       # [H, N]
        hT = hT + mm(Wn2, mT) + nb2

    # ---------------- EquivariantUpdate (tanh=False, ligand_diff=None) -------
    V = eqV_ref[...]                               # [H, 9]
    ew0, ew1 = V[:, 0:1], V[:, 1:2]
    cb1, bn1g, bn1b = V[:, 2:3], V[:, 3:4], V[:, 4:5]
    cb2, bn2g, bn2b = V[:, 5:6], V[:, 6:7], V[:, 7:8]
    cW3 = V[:, 8:9]                                # pre-scaled by 1/NORM_FACTOR

    t = bn(edge_pre(hT, eqWg_ref[...], ew0, ew1, cb1), bn1g, bn1b)
    t = bn(mm(eqW2_ref[...], t) + cb2, bn2g, bn2b)
    phi = jnp.sum(t * cW3, axis=0, keepdims=True)                  # [1, E]
    transT = cdT_ref[...] * phi                                    # [3, E] f32
    xT_out_ref[...] = xT_ref[...] + scatter_edges(transT, GcolT)   # [3, N]
    hT_out_ref[...] = hT


# --------------------------- parameter packing -------------------------------

def _pack_params(params):
    gWg, gW2, gWn, gWn2, gV, gab = [], [], [], [], [], []
    for p in params["gcl"]:
        gWg.append(jnp.concatenate([p["eW1c"].T, p["eW1r"].T], axis=0))   # [2H, H]
        gW2.append(p["eW2"].T)                                            # [H, H]
        gWn.append(jnp.concatenate([p["nW1h"].T,
                                    (p["nW1a"] / NORM_FACTOR).T], axis=1))  # [H, 2H]
        gWn2.append(p["nW2"].T)                                           # [H, H]
        gV.append(jnp.stack([p["eW1a"][0], p["eW1a"][1], p["eb1"][0],
                             p["bng"][0], p["bnb"][0], p["eb2"][0],
                             p["nb1"][0], p["nb2"][0], p["aW"][:, 0]],
                            axis=1))                                      # [H, 9]
        gab.append(p["ab"][0, 0])
    q = params["equiv"]
    eqWg = jnp.concatenate([q["cW1c"].T, q["cW1r"].T], axis=0)            # [2H, H]
    eqW2 = q["cW2"].T                                                     # [H, H]
    eqV = jnp.stack([q["cW1a"][0], q["cW1a"][1], q["cb1"][0],
                     q["bn1g"][0], q["bn1b"][0], q["cb2"][0],
                     q["bn2g"][0], q["bn2b"][0],
                     q["cW3"][:, 0] / NORM_FACTOR], axis=1)               # [H, 9]
    return (jnp.stack(gWg), jnp.stack(gW2), jnp.stack(gWn), jnp.stack(gWn2),
            jnp.stack(gV), jnp.stack(gab).astype(jnp.float32),
            eqWg, eqW2, eqV)


# --------------------------- forward wrapper ----------------------------------

@jax.jit
def equivariant_block_forward(params, h, x, row, col, edge_attr):
    N, H = h.shape
    E = row.shape[0]

    # coord2diff (tiny XLA glue, no matmuls)
    coord_diff = x[col] - x[row]
    radial = jnp.sum(coord_diff ** 2, axis=1, keepdims=True)
    coord_diff = coord_diff / (jnp.sqrt(radial + 1e-8) + NORM_CONSTANT)
    eaT = jnp.concatenate([radial, edge_attr], axis=1).T            # [2, E]
    cdT = coord_diff.T                                              # [3, E]

    # Single transposed one-hot gather matrix: rows [0:N) indicate col[e],
    # rows [N:2N) indicate row[e].  The scatter reuses its top half in-kernel,
    # so no separate scatter matrix is shipped.
    eye_n = jnp.eye(N, dtype=jnp.float32)
    GcrT = jnp.concatenate([eye_n[:, col], eye_n[:, row]], axis=0)  # [2N, E]
    # TODO(synk): for large graphs replace the dense O(N*E) one-hot with a
    # scalar-prefetched, edge-tiled gather/scatter (PrefetchScalarGridSpec +
    # "parallel" edge-tile grid + two-pass BN stat accumulation); the dense
    # single-grid-point form does not scale and uses one TensorCore only.

    gWg, gW2, gWn, gWn2, gV, gab, eqWg, eqW2, eqV = _pack_params(params)

    # Scoped-VMEM budget for the fully resident single-call kernel
    # (defaults: 16 MiB on v5e, 32 MiB on v6e/v7x).
    resident = 4 * (2 * N * E + 14 * H * E + 6 * H * N + 8 * (E + N)
                    + gWg.size + gW2.size + gWn.size + gWn2.size
                    + gV.size + eqWg.size + eqW2.size + eqV.size)
    vmem_limit = int(min(96 * 2**20, max(32 * 2**20, 2 * resident)))

    hT_out, xT_out = pl.pallas_call(
        fused_block_kernel,
        out_shape=(jax.ShapeDtypeStruct((H, N), jnp.float32),
                   jax.ShapeDtypeStruct((3, N), jnp.float32)),
        in_specs=[VMEM] * 13 + [SMEM],
        out_specs=(VMEM, VMEM),
        compiler_params=pltpu.CompilerParams(vmem_limit_bytes=vmem_limit),
    )(h.T, x.T, cdT, eaT, GcrT,
      gWg, gW2, gWn, gWn2, gV, eqWg, eqW2, eqV, gab)
    return hT_out.T, xT_out.T


# --------------------------- parameters ---------------------------------------

def _uniform(key, shape, fan_in):
    bound = 1.0 / (fan_in ** 0.5)
    return jax.random.uniform(key, shape, jnp.float32, -bound, bound)


def init_params(key, hidden_nf=HIDDEN_NF, edge_feat_nf=EDGE_FEAT_NF,
                n_layers=N_LAYERS):
    H = hidden_nf
    in_edge = 2 * H + edge_feat_nf
    params = {"gcl": [], "equiv": None}
    for _ in range(n_layers):
        key, k0, k1, k2, k3, k4, k5 = jax.random.split(key, 7)
        W1 = _uniform(k0, (in_edge, H), in_edge)
        nW1 = _uniform(k3, (2 * H, H), 2 * H)
        params["gcl"].append({
            "eW1c": W1[:H], "eW1r": W1[H:2 * H], "eW1a": W1[2 * H:],
            "eb1": jnp.zeros((1, H), jnp.float32),
            "bng": jnp.ones((1, H), jnp.float32),
            "bnb": jnp.zeros((1, H), jnp.float32),
            "eW2": _uniform(k1, (H, H), H),
            "eb2": jnp.zeros((1, H), jnp.float32),
            "aW": _uniform(k2, (H, 1), H),
            "ab": _uniform(k5, (1, 1), H),         # nn.Linear default bias init
            "nW1h": nW1[:H], "nW1a": nW1[H:],
            "nb1": jnp.zeros((1, H), jnp.float32),
            "nb2": jnp.zeros((1, H), jnp.float32),
            "nW2": _uniform(k4, (H, H), H),
        })
    key, k0, k1, k2 = jax.random.split(key, 4)
    cW1 = _uniform(k0, (in_edge, H), in_edge)
    params["equiv"] = {
        "cW1c": cW1[:H], "cW1r": cW1[H:2 * H], "cW1a": cW1[2 * H:],
        "cb1": jnp.zeros((1, H), jnp.float32),
        "bn1g": jnp.ones((1, H), jnp.float32),
        "bn1b": jnp.zeros((1, H), jnp.float32),
        "cW2": _uniform(k1, (H, H), H),
        "cb2": jnp.zeros((1, H), jnp.float32),
        "bn2g": jnp.ones((1, H), jnp.float32),
        "bn2b": jnp.zeros((1, H), jnp.float32),
        # xavier_uniform_(gain=0.001) on final Linear(H, 1, bias=False)
        "cW3": 0.001 * _uniform(k2, (H, 1), H),
    }
    return params


# --------------------------- pure-JAX f32 reference ---------------------------

def reference_forward(params, h, x, edge_index, edge_attr):
    row, col = edge_index
    N = h.shape[0]
    with jax.default_matmul_precision("highest"):
        coord_diff = x[col] - x[row]
        radial = jnp.sum(coord_diff ** 2, axis=1, keepdims=True)
        coord_diff = coord_diff / (jnp.sqrt(radial + 1e-8) + NORM_CONSTANT)
        ea = jnp.concatenate([radial, edge_attr], axis=1)

        def bn(t, g, b):
            m = t.mean(0, keepdims=True)
            v = ((t - m) ** 2).mean(0, keepdims=True)
            return (t - m) / jnp.sqrt(v + BN_EPS) * g + b

        def seg_sum(vals, idx, n):
            return jnp.zeros((n, vals.shape[1]), vals.dtype).at[idx].add(vals)

        for layer in range(N_LAYERS):
            p = params["gcl"][layer]
            W1 = jnp.concatenate([p["eW1c"], p["eW1r"], p["eW1a"]], 0)
            inp = jnp.concatenate([h[col], h[row], ea], 1)
            t = bn(inp @ W1 + p["eb1"], p["bng"], p["bnb"])
            ef = t @ p["eW2"] + p["eb2"]
            ef = ef * jax.nn.sigmoid(ef @ p["aW"] + p["ab"])
            agg = seg_sum(ef, col, N) / NORM_FACTOR
            nin = jnp.concatenate([h, agg], 1)
            nW1 = jnp.concatenate([p["nW1h"], p["nW1a"]], 0)
            h = h + ((nin @ nW1 + p["nb1"]) @ p["nW2"] + p["nb2"])
        p = params["equiv"]
        W1 = jnp.concatenate([p["cW1c"], p["cW1r"], p["cW1a"]], 0)
        inp = jnp.concatenate([h[col], h[row], ea], 1)
        t = bn(inp @ W1 + p["cb1"], p["bn1g"], p["bn1b"])
        t = bn(t @ p["cW2"] + p["cb2"], p["bn2g"], p["bn2b"])
        trans = coord_diff * (t @ p["cW3"])
        x = x + seg_sum(trans, col, N) / NORM_FACTOR
        return h, x


# ----------------------------------- main --------------------------------------

if __name__ == "__main__":
    key = jax.random.PRNGKey(0)
    kh, kx, ke, kp = jax.random.split(key, 4)

    N = 8
    H = HIDDEN_NF
    # fully-connected graph without self-loops
    rows, cols = [], []
    for i in range(N):
        for j in range(N):
            if i != j:
                rows.append(i)
                cols.append(j)
    row = jnp.array(rows, dtype=jnp.int32)
    col = jnp.array(cols, dtype=jnp.int32)
    E = int(row.shape[0])

    h = jax.random.normal(kh, (N, H), jnp.float32)
    x = jax.random.normal(kx, (N, 3), jnp.float32)
    edge_attr = jax.random.normal(ke, (E, EDGE_FEAT_NF - 1), jnp.float32)
    params = init_params(kp)

    h_out, x_out = equivariant_block_forward(params, h, x, row, col, edge_attr)
    jax.block_until_ready((h_out, x_out))

    h_ref, x_ref = reference_forward(params, h, x, (row, col), edge_attr)
    assert h_out.shape == (N, H) and x_out.shape == (N, 3)
    # Everything is f32 now; tolerances only cover matmul-order / MXU f32-pass
    # differences (observed error is orders of magnitude below these bounds).
    assert jnp.allclose(h_out, h_ref, rtol=1e-2, atol=1e-2), \
        float(jnp.max(jnp.abs(h_out - h_ref)))
    assert jnp.allclose(x_out, x_ref, rtol=1e-3, atol=1e-3), \
        float(jnp.max(jnp.abs(x_out - x_ref)))
    print("KERNEL_OK")
</pallas_src>

<mosaic_0001>
module attributes {stable_mosaic.version = 11 : i64} {
  func.func @fused_block_kernel(%arg0: memref<32x8xf32, #tpu.memory_space<vmem>>, %arg1: memref<3x8xf32, #tpu.memory_space<vmem>>, %arg2: memref<3x56xf32, #tpu.memory_space<vmem>>, %arg3: memref<2x56xf32, #tpu.memory_space<vmem>>, %arg4: memref<16x56xf32, #tpu.memory_space<vmem>>, %arg5: memref<2x64x32xf32, #tpu.memory_space<vmem>>, %arg6: memref<2x32x32xf32, #tpu.memory_space<vmem>>, %arg7: memref<2x32x64xf32, #tpu.memory_space<vmem>>, %arg8: memref<2x32x32xf32, #tpu.memory_space<vmem>>, %arg9: memref<2x32x9xf32, #tpu.memory_space<vmem>>, %arg10: memref<64x32xf32, #tpu.memory_space<vmem>>, %arg11: memref<32x32xf32, #tpu.memory_space<vmem>>, %arg12: memref<32x9xf32, #tpu.memory_space<vmem>>, %arg13: memref<2xf32, #tpu.memory_space<smem>>, %arg14: memref<32x8xf32, #tpu.memory_space<vmem>>, %arg15: memref<3x8xf32, #tpu.memory_space<vmem>>) attributes {dimension_semantics = [], scalar_prefetch = 0 : i64, scratch_operands = 0 : i64, tpu.core_type = #tpu.core_type<tc>} {
    %c0 = arith.constant 0 : index
    %c0_0 = arith.constant 0 : index
    %0 = vector.load %arg0[%c0, %c0_0] : memref<32x8xf32, #tpu.memory_space<vmem>>, vector<32x8xf32>
    %c0_1 = arith.constant 0 : index
    %c0_2 = arith.constant 0 : index
    %1 = vector.load %arg3[%c0_1, %c0_2] : memref<2x56xf32, #tpu.memory_space<vmem>>, vector<1x56xf32>
    %c1 = arith.constant 1 : index
    %c0_3 = arith.constant 0 : index
    %2 = vector.load %arg3[%c1, %c0_3] : memref<2x56xf32, #tpu.memory_space<vmem>>, vector<1x56xf32>
    %c0_4 = arith.constant 0 : index
    %c0_5 = arith.constant 0 : index
    %3 = vector.load %arg4[%c0_4, %c0_5] : memref<16x56xf32, #tpu.memory_space<vmem>>, vector<16x56xf32>
    %4 = vector.extract_strided_slice %3 {offsets = [0, 0], sizes = [8, 56], strides = [1, 1]} : vector<16x56xf32> to vector<8x56xf32>
    %c0_6 = arith.constant 0 : index
    %c0_7 = arith.constant 0 : index
    %c0_8 = arith.constant 0 : index
    %5 = vector.load %arg5[%c0_6, %c0_7, %c0_8] : memref<2x64x32xf32, #tpu.memory_space<vmem>>, vector<1x64x32xf32>
    %6 = vector.shape_cast %5 : vector<1x64x32xf32> to vector<64x32xf32>
    %c0_9 = arith.constant 0 : index
    %c0_10 = arith.constant 0 : index
    %c0_11 = arith.constant 0 : index
    %7 = vector.load %arg6[%c0_9, %c0_10, %c0_11] : memref<2x32x32xf32, #tpu.memory_space<vmem>>, vector<1x32x32xf32>
    %8 = vector.shape_cast %7 : vector<1x32x32xf32> to vector<32x32xf32>
    %c0_12 = arith.constant 0 : index
    %c0_13 = arith.constant 0 : index
    %c0_14 = arith.constant 0 : index
    %9 = vector.load %arg7[%c0_12, %c0_13, %c0_14] : memref<2x32x64xf32, #tpu.memory_space<vmem>>, vector<1x32x64xf32>
    %10 = vector.shape_cast %9 : vector<1x32x64xf32> to vector<32x64xf32>
    %c0_15 = arith.constant 0 : index
    %c0_16 = arith.constant 0 : index
    %c0_17 = arith.constant 0 : index
    %11 = vector.load %arg8[%c0_15, %c0_16, %c0_17] : memref<2x32x32xf32, #tpu.memory_space<vmem>>, vector<1x32x32xf32>
    %12 = vector.shape_cast %11 : vector<1x32x32xf32> to vector<32x32xf32>
    %c0_18 = arith.constant 0 : index
    %c0_19 = arith.constant 0 : index
    %c0_20 = arith.constant 0 : index
    %13 = vector.load %arg9[%c0_18, %c0_19, %c0_20] : memref<2x32x9xf32, #tpu.memory_space<vmem>>, vector<1x32x9xf32>
    %14 = vector.shape_cast %13 : vector<1x32x9xf32> to vector<32x9xf32>
    %15 = vector.extract_strided_slice %14 {offsets = [0, 0], sizes = [32, 1], strides = [1, 1]} : vector<32x9xf32> to vector<32x1xf32>
    %16 = vector.extract_strided_slice %14 {offsets = [0, 1], sizes = [32, 1], strides = [1, 1]} : vector<32x9xf32> to vector<32x1xf32>
    %17 = vector.extract_strided_slice %14 {offsets = [0, 2], sizes = [32, 1], strides = [1, 1]} : vector<32x9xf32> to vector<32x1xf32>
    %18 = vector.extract_strided_slice %14 {offsets = [0, 3], sizes = [32, 1], strides = [1, 1]} : vector<32x9xf32> to vector<32x1xf32>
    %19 = vector.extract_strided_slice %14 {offsets = [0, 4], sizes = [32, 1], strides = [1, 1]} : vector<32x9xf32> to vector<32x1xf32>
    %20 = vector.extract_strided_slice %14 {offsets = [0, 5], sizes = [32, 1], strides = [1, 1]} : vector<32x9xf32> to vector<32x1xf32>
    %21 = vector.extract_strided_slice %14 {offsets = [0, 6], sizes = [32, 1], strides = [1, 1]} : vector<32x9xf32> to vector<32x1xf32>
    %22 = vector.extract_strided_slice %14 {offsets = [0, 7], sizes = [32, 1], strides = [1, 1]} : vector<32x9xf32> to vector<32x1xf32>
    %23 = vector.extract_strided_slice %14 {offsets = [0, 8], sizes = [32, 1], strides = [1, 1]} : vector<32x9xf32> to vector<32x1xf32>
    %c0_21 = arith.constant 0 : index
    %24 = memref.load %arg13[%c0_21] : memref<2xf32, #tpu.memory_space<smem>>
    %cst = arith.constant dense<0.000000e+00> : vector<64x8xf32>
    %25 = tpu.matmul %6, %0, %cst {dimension_numbers = #tpu.dot_dimension_numbers<[1], [0], [0], [1], [0, 0, 1, 1], [], []>} : vector<64x32xf32>, vector<32x8xf32>, vector<64x8xf32> -> vector<64x8xf32>
    %26 = vector.extract_strided_slice %25 {offsets = [0, 0], sizes = [32, 8], strides = [1, 1]} : vector<64x8xf32> to vector<32x8xf32>
    %27 = vector.extract_strided_slice %25 {offsets = [32, 0], sizes = [32, 8], strides = [1, 1]} : vector<64x8xf32> to vector<32x8xf32>
    %28 = tpu.concatenate %26, %27 in 1 : vector<32x8xf32>, vector<32x8xf32> -> vector<32x16xf32>
    %cst_22 = arith.constant dense<0.000000e+00> : vector<32x56xf32>
    %29 = tpu.matmul %28, %3, %cst_22 {dimension_numbers = #tpu.dot_dimension_numbers<[1], [0], [0], [1], [0, 0, 1, 1], [], []>} : vector<32x16xf32>, vector<16x56xf32>, vector<32x56xf32> -> vector<32x56xf32>
    %30 = vector.broadcast %15 : vector<32x1xf32> to vector<32x56xf32>
    %31 = vector.broadcast %1 : vector<1x56xf32> to vector<32x56xf32>
    %32 = arith.mulf %30, %31 : vector<32x56xf32>
    %33 = arith.addf %29, %32 : vector<32x56xf32>
    %34 = vector.broadcast %16 : vector<32x1xf32> to vector<32x56xf32>
    %35 = vector.broadcast %2 : vector<1x56xf32> to vector<32x56xf32>
    %36 = arith.mulf %34, %35 : vector<32x56xf32>
    %37 = arith.addf %33, %36 : vector<32x56xf32>
    %38 = vector.broadcast %17 : vector<32x1xf32> to vector<32x56xf32>
    %39 = arith.addf %37, %38 : vector<32x56xf32>
    %cst_23 = arith.constant dense<0.000000e+00> : vector<32xf32>
    %40 = vector.multi_reduction <add>, %39, %cst_23 [1] : vector<32x56xf32> to vector<32xf32>
    %41 = vector.shape_cast %40 : vector<32xf32> to vector<32x1xf32>
    %cst_24 = arith.constant 5.600000e+01 : f32
    %42 = vector.broadcast %cst_24 : f32 to vector<32x1xf32>
    %43 = arith.divf %41, %42 : vector<32x1xf32>
    %44 = vector.broadcast %43 : vector<32x1xf32> to vector<32x56xf32>
    %45 = arith.subf %39, %44 : vector<32x56xf32>
    %46 = arith.mulf %45, %45 : vector<32x56xf32>
    %cst_25 = arith.constant dense<0.000000e+00> : vector<32xf32>
    %47 = vector.multi_reduction <add>, %46, %cst_25 [1] : vector<32x56xf32> to vector<32xf32>
    %48 = vector.shape_cast %47 : vector<32xf32> to vector<32x1xf32>
    %cst_26 = arith.constant 5.600000e+01 : f32
    %49 = vector.broadcast %cst_26 : f32 to vector<32x1xf32>
    %50 = arith.divf %48, %49 : vector<32x1xf32>
    %cst_27 = arith.constant 9.99999974E-6 : f32
    %51 = vector.broadcast %cst_27 : f32 to vector<32x1xf32>
    %52 = arith.addf %50, %51 : vector<32x1xf32>
    %53 = math.rsqrt %52 : vector<32x1xf32>
    %54 = vector.broadcast %53 : vector<32x1xf32> to vector<32x56xf32>
    %55 = arith.mulf %45, %54 : vector<32x56xf32>
    %56 = vector.broadcast %18 : vector<32x1xf32> to vector<32x56xf32>
    %57 = arith.mulf %55, %56 : vector<32x56xf32>
    %58 = vector.broadcast %19 : vector<32x1xf32> to vector<32x56xf32>
    %59 = arith.addf %57, %58 : vector<32x56xf32>
    %cst_28 = arith.constant dense<0.000000e+00> : vector<32x56xf32>
    %60 = tpu.matmul %8, %59, %cst_28 {dimension_numbers = #tpu.dot_dimension_numbers<[1], [0], [0], [1], [0, 0, 1, 1], [], []>} : vector<32x32xf32>, vector<32x56xf32>, vector<32x56xf32> -> vector<32x56xf32>
    %61 = vector.broadcast %20 : vector<32x1xf32> to vector<32x56xf32>
    %62 = arith.addf %60, %61 : vector<32x56xf32>
    %63 = vector.broadcast %23 : vector<32x1xf32> to vector<32x56xf32>
    %64 = arith.mulf %62, %63 : vector<32x56xf32>
    %cst_29 = arith.constant dense<0.000000e+00> : vector<56xf32>
    %65 = vector.multi_reduction <add>, %64, %cst_29 [0] : vector<32x56xf32> to vector<56xf32>
    %66 = vector.shape_cast %65 : vector<56xf32> to vector<1x56xf32>
    %67 = vector.broadcast %24 : f32 to vector<1x56xf32>
    %68 = arith.addf %66, %67 : vector<1x56xf32>
    %69 = arith.negf %68 : vector<1x56xf32>
    %70 = math.exp %69 : vector<1x56xf32>
    %cst_30 = arith.constant 1.000000e+00 : f32
    %71 = vector.broadcast %cst_30 : f32 to vector<1x56xf32>
    %72 = arith.addf %71, %70 : vector<1x56xf32>
    %73 = arith.divf %71, %72 : vector<1x56xf32>
    %74 = vector.broadcast %73 : vector<1x56xf32> to vector<32x56xf32>
    %75 = arith.mulf %62, %74 : vector<32x56xf32>
    %cst_31 = arith.constant dense<0.000000e+00> : vector<32x8xf32>
    %76 = tpu.matmul %75, %4, %cst_31 {dimension_numbers = #tpu.dot_dimension_numbers<[1], [1], [0], [0], [0, 0, 1, 0], [], []>} : vector<32x56xf32>, vector<8x56xf32>, vector<32x8xf32> -> vector<32x8xf32>
    %77 = tpu.concatenate %0, %76 in 0 : vector<32x8xf32>, vector<32x8xf32> -> vector<64x8xf32>
    %cst_32 = arith.constant dense<0.000000e+00> : vector<32x8xf32>
    %78 = tpu.matmul %10, %77, %cst_32 {dimension_numbers = #tpu.dot_dimension_numbers<[1], [0], [0], [1], [0, 0, 1, 1], [], []>} : vector<32x64xf32>, vector<64x8xf32>, vector<32x8xf32> -> vector<32x8xf32>
    %79 = vector.broadcast %21 : vector<32x1xf32> to vector<32x8xf32>
    %80 = arith.addf %78, %79 : vector<32x8xf32>
    %cst_33 = arith.constant dense<0.000000e+00> : vector<32x8xf32>
    %81 = tpu.matmul %12, %80, %cst_33 {dimension_numbers = #tpu.dot_dimension_numbers<[1], [0], [0], [1], [0, 0, 1, 1], [], []>} : vector<32x32xf32>, vector<32x8xf32>, vector<32x8xf32> -> vector<32x8xf32>
    %82 = arith.addf %0, %81 : vector<32x8xf32>
    %83 = vector.broadcast %22 : vector<32x1xf32> to vector<32x8xf32>
    %84 = arith.addf %82, %83 : vector<32x8xf32>
    %c1_34 = arith.constant 1 : index
    %c0_35 = arith.constant 0 : index
    %c0_36 = arith.constant 0 : index
    %85 = vector.load %arg5[%c1_34, %c0_35, %c0_36] : memref<2x64x32xf32, #tpu.memory_space<vmem>>, vector<1x64x32xf32>
    %86 = vector.shape_cast %85 : vector<1x64x32xf32> to vector<64x32xf32>
    %c1_37 = arith.constant 1 : index
    %c0_38 = arith.constant 0 : index
    %c0_39 = arith.constant 0 : index
    %87 = vector.load %arg6[%c1_37, %c0_38, %c0_39] : memref<2x32x32xf32, #tpu.memory_space<vmem>>, vector<1x32x32xf32>
    %88 = vector.shape_cast %87 : vector<1x32x32xf32> to vector<32x32xf32>
    %c1_40 = arith.constant 1 : index
    %c0_41 = arith.constant 0 : index
    %c0_42 = arith.constant 0 : index
    %89 = vector.load %arg7[%c1_40, %c0_41, %c0_42] : memref<2x32x64xf32, #tpu.memory_space<vmem>>, vector<1x32x64xf32>
    %90 = vector.shape_cast %89 : vector<1x32x64xf32> to vector<32x64xf32>
    %c1_43 = arith.constant 1 : index
    %c0_44 = arith.constant 0 : index
    %c0_45 = arith.constant 0 : index
    %91 = vector.load %arg8[%c1_43, %c0_44, %c0_45] : memref<2x32x32xf32, #tpu.memory_space<vmem>>, vector<1x32x32xf32>
    %92 = vector.shape_cast %91 : vector<1x32x32xf32> to vector<32x32xf32>
    %c1_46 = arith.constant 1 : index
    %c0_47 = arith.constant 0 : index
    %c0_48 = arith.constant 0 : index
    %93 = vector.load %arg9[%c1_46, %c0_47, %c0_48] : memref<2x32x9xf32, #tpu.memory_space<vmem>>, vector<1x32x9xf32>
    %94 = vector.shape_cast %93 : vector<1x32x9xf32> to vector<32x9xf32>
    %95 = vector.extract_strided_slice %94 {offsets = [0, 0], sizes = [32, 1], strides = [1, 1]} : vector<32x9xf32> to vector<32x1xf32>
    %96 = vector.extract_strided_slice %94 {offsets = [0, 1], sizes = [32, 1], strides = [1, 1]} : vector<32x9xf32> to vector<32x1xf32>
    %97 = vector.extract_strided_slice %94 {offsets = [0, 2], sizes = [32, 1], strides = [1, 1]} : vector<32x9xf32> to vector<32x1xf32>
    %98 = vector.extract_strided_slice %94 {offsets = [0, 3], sizes = [32, 1], strides = [1, 1]} : vector<32x9xf32> to vector<32x1xf32>
    %99 = vector.extract_strided_slice %94 {offsets = [0, 4], sizes = [32, 1], strides = [1, 1]} : vector<32x9xf32> to vector<32x1xf32>
    %100 = vector.extract_strided_slice %94 {offsets = [0, 5], sizes = [32, 1], strides = [1, 1]} : vector<32x9xf32> to vector<32x1xf32>
    %101 = vector.extract_strided_slice %94 {offsets = [0, 6], sizes = [32, 1], strides = [1, 1]} : vector<32x9xf32> to vector<32x1xf32>
    %102 = vector.extract_strided_slice %94 {offsets = [0, 7], sizes = [32, 1], strides = [1, 1]} : vector<32x9xf32> to vector<32x1xf32>
    %103 = vector.extract_strided_slice %94 {offsets = [0, 8], sizes = [32, 1], strides = [1, 1]} : vector<32x9xf32> to vector<32x1xf32>
    %c1_49 = arith.constant 1 : index
    %104 = memref.load %arg13[%c1_49] : memref<2xf32, #tpu.memory_space<smem>>
    %cst_50 = arith.constant dense<0.000000e+00> : vector<64x8xf32>
    %105 = tpu.matmul %86, %84, %cst_50 {dimension_numbers = #tpu.dot_dimension_numbers<[1], [0], [0], [1], [0, 0, 1, 1], [], []>} : vector<64x32xf32>, vector<32x8xf32>, vector<64x8xf32> -> vector<64x8xf32>
    %106 = vector.extract_strided_slice %105 {offsets = [0, 0], sizes = [32, 8], strides = [1, 1]} : vector<64x8xf32> to vector<32x8xf32>
    %107 = vector.extract_strided_slice %105 {offsets = [32, 0], sizes = [32, 8], strides = [1, 1]} : vector<64x8xf32> to vector<32x8xf32>
    %108 = tpu.concatenate %106, %107 in 1 : vector<32x8xf32>, vector<32x8xf32> -> vector<32x16xf32>
    %cst_51 = arith.constant dense<0.000000e+00> : vector<32x56xf32>
    %109 = tpu.matmul %108, %3, %cst_51 {dimension_numbers = #tpu.dot_dimension_numbers<[1], [0], [0], [1], [0, 0, 1, 1], [], []>} : vector<32x16xf32>, vector<16x56xf32>, vector<32x56xf32> -> vector<32x56xf32>
    %110 = vector.broadcast %95 : vector<32x1xf32> to vector<32x56xf32>
    %111 = vector.broadcast %1 : vector<1x56xf32> to vector<32x56xf32>
    %112 = arith.mulf %110, %111 : vector<32x56xf32>
    %113 = arith.addf %109, %112 : vector<32x56xf32>
    %114 = vector.broadcast %96 : vector<32x1xf32> to vector<32x56xf32>
    %115 = vector.broadcast %2 : vector<1x56xf32> to vector<32x56xf32>
    %116 = arith.mulf %114, %115 : vector<32x56xf32>
    %117 = arith.addf %113, %116 : vector<32x56xf32>
    %118 = vector.broadcast %97 : vector<32x1xf32> to vector<32x56xf32>
    %119 = arith.addf %117, %118 : vector<32x56xf32>
    %cst_52 = arith.constant dense<0.000000e+00> : vector<32xf32>
    %120 = vector.multi_reduction <add>, %119, %cst_52 [1] : vector<32x56xf32> to vector<32xf32>
    %121 = vector.shape_cast %120 : vector<32xf32> to vector<32x1xf32>
    %cst_53 = arith.constant 5.600000e+01 : f32
    %122 = vector.broadcast %cst_53 : f32 to vector<32x1xf32>
    %123 = arith.divf %121, %122 : vector<32x1xf32>
    %124 = vector.broadcast %123 : vector<32x1xf32> to vector<32x56xf32>
    %125 = arith.subf %119, %124 : vector<32x56xf32>
    %126 = arith.mulf %125, %125 : vector<32x56xf32>
    %cst_54 = arith.constant dense<0.000000e+00> : vector<32xf32>
    %127 = vector.multi_reduction <add>, %126, %cst_54 [1] : vector<32x56xf32> to vector<32xf32>
    %128 = vector.shape_cast %127 : vector<32xf32> to vector<32x1xf32>
    %cst_55 = arith.constant 5.600000e+01 : f32
    %129 = vector.broadcast %cst_55 : f32 to vector<32x1xf32>
    %130 = arith.divf %128, %129 : vector<32x1xf32>
    %cst_56 = arith.constant 9.99999974E-6 : f32
    %131 = vector.broadcast %cst_56 : f32 to vector<32x1xf32>
    %132 = arith.addf %130, %131 : vector<32x1xf32>
    %133 = math.rsqrt %132 : vector<32x1xf32>
    %134 = vector.broadcast %133 : vector<32x1xf32> to vector<32x56xf32>
    %135 = arith.mulf %125, %134 : vector<32x56xf32>
    %136 = vector.broadcast %98 : vector<32x1xf32> to vector<32x56xf32>
    %137 = arith.mulf %135, %136 : vector<32x56xf32>
    %138 = vector.broadcast %99 : vector<32x1xf32> to vector<32x56xf32>
    %139 = arith.addf %137, %138 : vector<32x56xf32>
    %cst_57 = arith.constant dense<0.000000e+00> : vector<32x56xf32>
    %140 = tpu.matmul %88, %139, %cst_57 {dimension_numbers = #tpu.dot_dimension_numbers<[1], [0], [0], [1], [0, 0, 1, 1], [], []>} : vector<32x32xf32>, vector<32x56xf32>, vector<32x56xf32> -> vector<32x56xf32>
    %141 = vector.broadcast %100 : vector<32x1xf32> to vector<32x56xf32>
    %142 = arith.addf %140, %141 : vector<32x56xf32>
    %143 = vector.broadcast %103 : vector<32x1xf32> to vector<32x56xf32>
    %144 = arith.mulf %142, %143 : vector<32x56xf32>
    %cst_58 = arith.constant dense<0.000000e+00> : vector<56xf32>
    %145 = vector.multi_reduction <add>, %144, %cst_58 [0] : vector<32x56xf32> to vector<56xf32>
    %146 = vector.shape_cast %145 : vector<56xf32> to vector<1x56xf32>
    %147 = vector.broadcast %104 : f32 to vector<1x56xf32>
    %148 = arith.addf %146, %147 : vector<1x56xf32>
    %149 = arith.negf %148 : vector<1x56xf32>
    %150 = math.exp %149 : vector<1x56xf32>
    %cst_59 = arith.constant 1.000000e+00 : f32
    %151 = vector.broadcast %cst_59 : f32 to vector<1x56xf32>
    %152 = arith.addf %151, %150 : vector<1x56xf32>
    %153 = arith.divf %151, %152 : vector<1x56xf32>
    %154 = vector.broadcast %153 : vector<1x56xf32> to vector<32x56xf32>
    %155 = arith.mulf %142, %154 : vector<32x56xf32>
    %cst_60 = arith.constant dense<0.000000e+00> : vector<32x8xf32>
    %156 = tpu.matmul %155, %4, %cst_60 {dimension_numbers = #tpu.dot_dimension_numbers<[1], [1], [0], [0], [0, 0, 1, 0], [], []>} : vector<32x56xf32>, vector<8x56xf32>, vector<32x8xf32> -> vector<32x8xf32>
    %157 = tpu.concatenate %84, %156 in 0 : vector<32x8xf32>, vector<32x8xf32> -> vector<64x8xf32>
    %cst_61 = arith.constant dense<0.000000e+00> : vector<32x8xf32>
    %158 = tpu.matmul %90, %157, %cst_61 {dimension_numbers = #tpu.dot_dimension_numbers<[1], [0], [0], [1], [0, 0, 1, 1], [], []>} : vector<32x64xf32>, vector<64x8xf32>, vector<32x8xf32> -> vector<32x8xf32>
    %159 = vector.broadcast %101 : vector<32x1xf32> to vector<32x8xf32>
    %160 = arith.addf %158, %159 : vector<32x8xf32>
    %cst_62 = arith.constant dense<0.000000e+00> : vector<32x8xf32>
    %161 = tpu.matmul %92, %160, %cst_62 {dimension_numbers = #tpu.dot_dimension_numbers<[1], [0], [0], [1], [0, 0, 1, 1], [], []>} : vector<32x32xf32>, vector<32x8xf32>, vector<32x8xf32> -> vector<32x8xf32>
    %162 = arith.addf %84, %161 : vector<32x8xf32>
    %163 = vector.broadcast %102 : vector<32x1xf32> to vector<32x8xf32>
    %164 = arith.addf %162, %163 : vector<32x8xf32>
    %c0_63 = arith.constant 0 : index
    %c0_64 = arith.constant 0 : index
    %165 = vector.load %arg12[%c0_63, %c0_64] : memref<32x9xf32, #tpu.memory_space<vmem>>, vector<32x9xf32>
    %166 = vector.extract_strided_slice %165 {offsets = [0, 0], sizes = [32, 1], strides = [1, 1]} : vector<32x9xf32> to vector<32x1xf32>
    %167 = vector.extract_strided_slice %165 {offsets = [0, 1], sizes = [32, 1], strides = [1, 1]} : vector<32x9xf32> to vector<32x1xf32>
    %168 = vector.extract_strided_slice %165 {offsets = [0, 2], sizes = [32, 1], strides = [1, 1]} : vector<32x9xf32> to vector<32x1xf32>
    %169 = vector.extract_strided_slice %165 {offsets = [0, 3], sizes = [32, 1], strides = [1, 1]} : vector<32x9xf32> to vector<32x1xf32>
    %170 = vector.extract_strided_slice %165 {offsets = [0, 4], sizes = [32, 1], strides = [1, 1]} : vector<32x9xf32> to vector<32x1xf32>
    %171 = vector.extract_strided_slice %165 {offsets = [0, 5], sizes = [32, 1], strides = [1, 1]} : vector<32x9xf32> to vector<32x1xf32>
    %172 = vector.extract_strided_slice %165 {offsets = [0, 6], sizes = [32, 1], strides = [1, 1]} : vector<32x9xf32> to vector<32x1xf32>
    %173 = vector.extract_strided_slice %165 {offsets = [0, 7], sizes = [32, 1], strides = [1, 1]} : vector<32x9xf32> to vector<32x1xf32>
    %174 = vector.extract_strided_slice %165 {offsets = [0, 8], sizes = [32, 1], strides = [1, 1]} : vector<32x9xf32> to vector<32x1xf32>
    %c0_65 = arith.constant 0 : index
    %c0_66 = arith.constant 0 : index
    %175 = vector.load %arg10[%c0_65, %c0_66] : memref<64x32xf32, #tpu.memory_space<vmem>>, vector<64x32xf32>
    %cst_67 = arith.constant dense<0.000000e+00> : vector<64x8xf32>
    %176 = tpu.matmul %175, %164, %cst_67 {dimension_numbers = #tpu.dot_dimension_numbers<[1], [0], [0], [1], [0, 0, 1, 1], [], []>} : vector<64x32xf32>, vector<32x8xf32>, vector<64x8xf32> -> vector<64x8xf32>
    %177 = vector.extract_strided_slice %176 {offsets = [0, 0], sizes = [32, 8], strides = [1, 1]} : vector<64x8xf32> to vector<32x8xf32>
    %178 = vector.extract_strided_slice %176 {offsets = [32, 0], sizes = [32, 8], strides = [1, 1]} : vector<64x8xf32> to vector<32x8xf32>
    %179 = tpu.concatenate %177, %178 in 1 : vector<32x8xf32>, vector<32x8xf32> -> vector<32x16xf32>
    %cst_68 = arith.constant dense<0.000000e+00> : vector<32x56xf32>
    %180 = tpu.matmul %179, %3, %cst_68 {dimension_numbers = #tpu.dot_dimension_numbers<[1], [0], [0], [1], [0, 0, 1, 1], [], []>} : vector<32x16xf32>, vector<16x56xf32>, vector<32x56xf32> -> vector<32x56xf32>
    %181 = vector.broadcast %166 : vector<32x1xf32> to vector<32x56xf32>
    %182 = vector.broadcast %1 : vector<1x56xf32> to vector<32x56xf32>
    %183 = arith.mulf %181, %182 : vector<32x56xf32>
    %184 = arith.addf %180, %183 : vector<32x56xf32>
    %185 = vector.broadcast %167 : vector<32x1xf32> to vector<32x56xf32>
    %186 = vector.broadcast %2 : vector<1x56xf32> to vector<32x56xf32>
    %187 = arith.mulf %185, %186 : vector<32x56xf32>
    %188 = arith.addf %184, %187 : vector<32x56xf32>
    %189 = vector.broadcast %168 : vector<32x1xf32> to vector<32x56xf32>
    %190 = arith.addf %188, %189 : vector<32x56xf32>
    %cst_69 = arith.constant dense<0.000000e+00> : vector<32xf32>
    %191 = vector.multi_reduction <add>, %190, %cst_69 [1] : vector<32x56xf32> to vector<32xf32>
    %192 = vector.shape_cast %191 : vector<32xf32> to vector<32x1xf32>
    %cst_70 = arith.constant 5.600000e+01 : f32
    %193 = vector.broadcast %cst_70 : f32 to vector<32x1xf32>
    %194 = arith.divf %192, %193 : vector<32x1xf32>
    %195 = vector.broadcast %194 : vector<32x1xf32> to vector<32x56xf32>
    %196 = arith.subf %190, %195 : vector<32x56xf32>
    %197 = arith.mulf %196, %196 : vector<32x56xf32>
    %cst_71 = arith.constant dense<0.000000e+00> : vector<32xf32>
    %198 = vector.multi_reduction <add>, %197, %cst_71 [1] : vector<32x56xf32> to vector<32xf32>
    %199 = vector.shape_cast %198 : vector<32xf32> to vector<32x1xf32>
    %cst_72 = arith.constant 5.600000e+01 : f32
    %200 = vector.broadcast %cst_72 : f32 to vector<32x1xf32>
    %201 = arith.divf %199, %200 : vector<32x1xf32>
    %cst_73 = arith.constant 9.99999974E-6 : f32
    %202 = vector.broadcast %cst_73 : f32 to vector<32x1xf32>
    %203 = arith.addf %201, %202 : vector<32x1xf32>
    %204 = math.rsqrt %203 : vector<32x1xf32>
    %205 = vector.broadcast %204 : vector<32x1xf32> to vector<32x56xf32>
    %206 = arith.mulf %196, %205 : vector<32x56xf32>
    %207 = vector.broadcast %169 : vector<32x1xf32> to vector<32x56xf32>
    %208 = arith.mulf %206, %207 : vector<32x56xf32>
    %209 = vector.broadcast %170 : vector<32x1xf32> to vector<32x56xf32>
    %210 = arith.addf %208, %209 : vector<32x56xf32>
    %c0_74 = arith.constant 0 : index
    %c0_75 = arith.constant 0 : index
    %211 = vector.load %arg11[%c0_74, %c0_75] : memref<32x32xf32, #tpu.memory_space<vmem>>, vector<32x32xf32>
    %cst_76 = arith.constant dense<0.000000e+00> : vector<32x56xf32>
    %212 = tpu.matmul %211, %210, %cst_76 {dimension_numbers = #tpu.dot_dimension_numbers<[1], [0], [0], [1], [0, 0, 1, 1], [], []>} : vector<32x32xf32>, vector<32x56xf32>, vector<32x56xf32> -> vector<32x56xf32>
    %213 = vector.broadcast %171 : vector<32x1xf32> to vector<32x56xf32>
    %214 = arith.addf %212, %213 : vector<32x56xf32>
    %cst_77 = arith.constant dense<0.000000e+00> : vector<32xf32>
    %215 = vector.multi_reduction <add>, %214, %cst_77 [1] : vector<32x56xf32> to vector<32xf32>
    %216 = vector.shape_cast %215 : vector<32xf32> to vector<32x1xf32>
    %cst_78 = arith.constant 5.600000e+01 : f32
    %217 = vector.broadcast %cst_78 : f32 to vector<32x1xf32>
    %218 = arith.divf %216, %217 : vector<32x1xf32>
    %219 = vector.broadcast %218 : vector<32x1xf32> to vector<32x56xf32>
    %220 = arith.subf %214, %219 : vector<32x56xf32>
    %221 = arith.mulf %220, %220 : vector<32x56xf32>
    %cst_79 = arith.constant dense<0.000000e+00> : vector<32xf32>
    %222 = vector.multi_reduction <add>, %221, %cst_79 [1] : vector<32x56xf32> to vector<32xf32>
    %223 = vector.shape_cast %222 : vector<32xf32> to vector<32x1xf32>
    %cst_80 = arith.constant 5.600000e+01 : f32
    %224 = vector.broadcast %cst_80 : f32 to vector<32x1xf32>
    %225 = arith.divf %223, %224 : vector<32x1xf32>
    %cst_81 = arith.constant 9.99999974E-6 : f32
    %226 = vector.broadcast %cst_81 : f32 to vector<32x1xf32>
    %227 = arith.addf %225, %226 : vector<32x1xf32>
    %228 = math.rsqrt %227 : vector<32x1xf32>
    %229 = vector.broadcast %228 : vector<32x1xf32> to vector<32x56xf32>
    %230 = arith.mulf %220, %229 : vector<32x56xf32>
    %231 = vector.broadcast %172 : vector<32x1xf32> to vector<32x56xf32>
    %232 = arith.mulf %230, %231 : vector<32x56xf32>
    %233 = vector.broadcast %173 : vector<32x1xf32> to vector<32x56xf32>
    %234 = arith.addf %232, %233 : vector<32x56xf32>
    %235 = vector.broadcast %174 : vector<32x1xf32> to vector<32x56xf32>
    %236 = arith.mulf %234, %235 : vector<32x56xf32>
    %cst_82 = arith.constant dense<0.000000e+00> : vector<56xf32>
    %237 = vector.multi_reduction <add>, %236, %cst_82 [0] : vector<32x56xf32> to vector<56xf32>
    %238 = vector.shape_cast %237 : vector<56xf32> to vector<1x56xf32>
    %c0_83 = arith.constant 0 : index
    %c0_84 = arith.constant 0 : index
    %239 = vector.load %arg2[%c0_83, %c0_84] : memref<3x56xf32, #tpu.memory_space<vmem>>, vector<3x56xf32>
    %240 = vector.broadcast %238 : vector<1x56xf32> to vector<3x56xf32>
    %241 = arith.mulf %239, %240 : vector<3x56xf32>
    %c0_85 = arith.constant 0 : index
    %c0_86 = arith.constant 0 : index
    %242 = vector.load %arg1[%c0_85, %c0_86] : memref<3x8xf32, #tpu.memory_space<vmem>>, vector<3x8xf32>
    %cst_87 = arith.constant dense<0.000000e+00> : vector<3x8xf32>
    %243 = tpu.matmul %241, %4, %cst_87 {dimension_numbers = #tpu.dot_dimension_numbers<[1], [1], [0], [0], [0, 0, 1, 0], [], []>} : vector<3x56xf32>, vector<8x56xf32>, vector<3x8xf32> -> vector<3x8xf32>
    %244 = arith.addf %242, %243 : vector<3x8xf32>
    %c0_88 = arith.constant 0 : index
    %c0_89 = arith.constant 0 : index
    %245 = vector.load %arg15[%c0_88, %c0_89] : memref<3x8xf32, #tpu.memory_space<vmem>>, vector<3x8xf32>
    tpu.vector_store %arg15[%c0_88, %c0_89], %244 {strides = array<i32>} : memref<3x8xf32, #tpu.memory_space<vmem>>, vector<3x8xf32>,
    %c0_90 = arith.constant 0 : index
    %c0_91 = arith.constant 0 : index
    %246 = vector.load %arg14[%c0_90, %c0_91] : memref<32x8xf32, #tpu.memory_space<vmem>>, vector<32x8xf32>
    tpu.vector_store %arg14[%c0_90, %c0_91], %164 {strides = array<i32>} : memref<32x8xf32, #tpu.memory_space<vmem>>, vector<32x8xf32>,
    return
  }
}

</mosaic_0001>

<bundles_post_ra>
// kernel: equivariant_block_forward.1
= control target key start
LH: loop header
LB: loop body
LE: loop exit
PB: predicated region body
PF: predicated region fallthrough
CT: control target
= control target key end

     0   :  { %21 = vsyncpa [#allocation4], 0  ;;  %s4170_s0 = inlined_call_operand.vmem [shape: f32[32,8], index: 0, kind: input, shape index: {}]   ;;  %s4171_s1 = inlined_call_operand.vmem [shape: f32[3,8], index: 1, kind: input, shape index: {}]   ;;  %s4172_s2 = inlined_call_operand.vmem [shape: f32[3,56], index: 2, kind: input, shape index: {}]   ;;  %s4173_s3 = inlined_call_operand.vmem [shape: f32[2,56], index: 3, kind: input, shape index: {}]   ;;  %s4174_s4 = inlined_call_operand.vmem [shape: f32[16,56], index: 4, kind: input, shape index: {}]   ;;  %s4175_s5 = inlined_call_operand.vmem [shape: f32[2,64,32], index: 5, kind: input, shape index: {}]   ;;  %s4176_s6 = inlined_call_operand.vmem [shape: f32[2,32,32], index: 6, kind: input, shape index: {}]   ;;  %s4177_s7 = inlined_call_operand.vmem [shape: f32[2,32,64], index: 7, kind: input, shape index: {}]   ;;  %s4178_s8 = inlined_call_operand.vmem [shape: f32[2,32,32], index: 8, kind: input, shape index: {}]   ;;  %s4179_s9 = inlined_call_operand.vmem [shape: f32[2,32,9], index: 9, kind: input, shape index: {}]   ;;  %s4180_s10 = inlined_call_operand.vmem [shape: f32[64,32], index: 10, kind: input, shape index: {}]   ;;  %s4181_s11 = inlined_call_operand.vmem [shape: f32[32,32], index: 11, kind: input, shape index: {}]   ;;  %s4182_s12 = inlined_call_operand.vmem [shape: f32[32,9], index: 12, kind: input, shape index: {}]   ;;  %s4183_s13 = inlined_call_operand.vmem [shape: f32[2], index: 13, kind: input, shape index: {}]   ;;  %s4184_s14 = inlined_call_operand.vmem [shape: f32[32,8], index: 14, kind: output, shape index: {0}]   ;;  %s4185_s15 = inlined_call_operand.hbm [shape: f32[3,8], index: 15, kind: output, shape index: {1}]  }
   0x1   :  { %22 = vsyncpa [#allocation3], 0  ;;  %s55_s20 = sshll.u32 %s4183_s13, 4  ;;  %s56_s20 = int_to_ptr.vmem [resolvable:$true] %s55_s20 }
   0x2   :  { %s3281_s21 = scalar_lea.vmem %s56_s20, 16  ;;  %p3286_p1 = scmp.lt.s32.totalorder %s56_s20, %s56_s20 }
   0x3   :  { %p3282_p0 = scmp.ne.s32.totalorder %s56_s20, %s3281_s21  ;;  %p3287_p2 = scmp.lt.s32.totalorder %s3281_s21, %s3281_s21 }
   0x5   :  { %p3288_p3 = por %p3287_p2, %p3286_p1 }
   0x7   :  { %p3289_p4 = pnand %p3288_p3, %p3282_p0 }
   0x9   :  { %3292 = shalt.err (!%p3289_p4)
}
   0xa   :  { %s3317_s22 = smov [#allocation2]  }
   0xb   :  { %58 = dma.vmem_to_smem %s56_s20, 16, %s3317_s22, [#allocation4]  }
   0xc   :  { %3313 = dma.done.wait [#allocation4], 16  }
   0xd   :  { %3314 = vsyncadd [#allocation4], 4294967280 }
   0xe   :  { %62 = sfence }
   0xf   :  { %v3417_v0 = vld [vmem:[%s4170_s0 + $0x18] sm:$0xff]  ;;  %v3422_v1 = vld [vmem:[%s4170_s0 + $0x10] sm:$0xff]  ;;  %vm96_vm0 = vcmask 261120   ;;  %v71_v2 = vld [vmem:[%s4175_s5] sm:$0xff]  ;;  %v3318_v19 = vmov 0   ;;  %s3319_s18 = smov 8  }
  0x10   :  { %2930 = vmatprep.subr.mxu0 %v3417_v0  ;;  %v3432_v3 = vld [vmem:[%s4170_s0 + $0x8] sm:$0xff]  ;;  %2938 = vmatprep.mubr.msk.f32.mxu0 %vm96_vm0, %v71_v2  ;;  %v3440_v4 = vld [vmem:[%s4170_s0] sm:$0xff]  ;;  %v73_v6 = vld [vmem:[%s4175_s5 + $0x10] sm:$0xff]  ;;  %v3320_v27 = vmov 1   ;;  %v3321_v28 = vmov 2   ;;  %vm242_vm1 = vcmask 64512  }
  0x11   :  { %2931 = vmatpush3.msra.mxu0 %v3417_v0  ;;  %v72_v5 = vld [vmem:[%s4175_s5 + $0x8] sm:$0xff]  ;;  %v74_v7 = vld [vmem:[%s4175_s5 + $0x18] sm:$0xff]  ;;  %v75_v8 = vld [vmem:[%s4175_s5 + $0x20] sm:$0xff]  ;;  %3170 = vset.pattern.permute.xlu1 %v3318_v19  ;;  %vm275_vm2 = vcmask 130048   ;;  %v3322_v37 = vmov 3   ;;  %vm421_vm3 = vcmask 457728  }
  0x12   :  { %2932 = vmatprep.subr.mxu0 %v3422_v1  ;;  %v76_v9 = vld [vmem:[%s4175_s5 + $0x28] sm:$0xff]  ;;  %v77_v10 = vld [vmem:[%s4175_s5 + $0x30] sm:$0xff]  ;;  %v78_v11 = vld [vmem:[%s4175_s5 + $0x38] sm:$0xff]  ;;  %3169 = vset.pattern.permute.xlu0 %v3318_v19  ;;  %s95_s22 = sld [smem:[#allocation2]]  ;;  %vm789_vm4 = vcmask 523264   ;;  %vm3329_vm5 = vmmov 0  }
  0x13   :  { %2933 = vmatpush3.msra.mxu0 %v3422_v1  ;;  %v3477_v12 = vld [vmem:[%s4174_s4 + $0x8] sm:$0xff]  ;;  %v3484_v13 = vld [vmem:[%s4174_s4] sm:$0xff]  ;;  %v3496_v23 = vld [vmem:[%s4179_s9 + $0x18] sm:$0xff]  ;;  %s3330_s19 = smov [#allocation5]   ;;  %vm2670_vm6 = vcmask 59392  }
  0x14   :  { %2934 = vmatprep.subr.mxu0 %v3432_v3  ;;  %2950 = vmatprep.subr.mxu1 %v3477_v12  ;;  %v3503_v24 = vld [vmem:[%s4179_s9 + $0x10] sm:$0xff]  ;;  %v3508_v25 = vld [vmem:[%s4179_s9 + $0x8] sm:$0xff]  ;;  %v3515_v26 = vld [vmem:[%s4179_s9] sm:$0xff]  ;;  %s2684_s20 = sshll.u32 %s3330_s19, 4  ;;  %s2685_s20 = int_to_ptr.vmem [resolvable:$true] %s2684_s20 }
  0x15   :  { %2935 = vmatpush3.msra.mxu0 %v3432_v3  ;;  %2951 = vmatpush3.msra.mxu1 %v3477_v12  ;;  %v3542_v45 = vld [vmem:[%s4173_s3] ss:$0 sm:$0xff]  ;;  %v3548_v49 = vld [vmem:[%s4173_s3 + $0x1] ss:$0 sm:$0xff]  ;;  %s3293_s0 = scalar_lea.vmem %s2685_s20, 64  ;;  %p3298_p6 = scmp.lt.s32.totalorder %s2685_s20, %s2685_s20 }
  0x16   :  { %2936 = vmatprep.subr.mxu0 %v3440_v4  ;;  %2952 = vmatprep.subr.mxu1 %v3484_v13  ;;  %p3294_p5 = scmp.ne.s32.totalorder %s2685_s20, %s3293_s0  ;;  %p3299_p7 = scmp.lt.s32.totalorder %s3293_s0, %s3293_s0 }
  0x17   :  { %2937 = vmatpush3.msra.mxu0 %v3440_v4  ;;  %2953 = vmatpush3.msra.mxu1 %v3484_v13 }
  0x18   :  { %2939 = vmatmul.mubr.msk.f32.vlgmr.msra.gmra.mxu0 %vm96_vm0, %v72_v5  ;;  %p3300_p8 = por %p3299_p7, %p3298_p6 }
  0x19   :  { %2941 = vmatprep.mubr.msk.f32.mxu0 %vm96_vm0, %v73_v6 }
  0x1a   :  { %p3301_p9 = pnand %p3300_p8, %p3294_p5 }
  0x1c   :  { %2942 = vmatmul.mubr.msk.f32.gmra.mxu0 %vm96_vm0, %v74_v7 }
  0x1d   :  { %2944 = vmatprep.mubr.msk.f32.mxu0 %vm96_vm0, %v75_v8 }
  0x20   :  { %2945 = vmatmul.mubr.msk.f32.gmra.mxu0 %vm96_vm0, %v76_v9 }
  0x21   :  { %2947 = vmatprep.mubr.msk.f32.mxu0 %vm96_vm0, %v77_v10 }
  0x24   :  { %2948 = vmatmul.mubr.msk.f32.gmra.mxu0 %vm96_vm0, %v78_v11 }
  0xd8   :  { %v2940_v14 = vpop.f32.mrf.mxu0 }
  0xda   :  { %v187_v15 = vpop.f32.mrf.mxu0 }
  0xdc   :  { %v2943_v16 = vpop.f32.mrf.mxu0 }
  0xde   :  { %v197_v17 = vpop.f32.mrf.mxu0 }
  0xe0   :  { %v2946_v18 = vpop.f32.mrf.mxu0 }
  0xe2   :  { %v207_v20 = vpop.f32.mrf.mxu0 }
  0xe3   :  { %230 = vrot.lane.b32.xlu0 %v207_v20, %s3319_s18 }
  0xe4   :  { %v2949_v21 = vpop.f32.mrf.mxu0 }
  0xe6   :  { %v217_v22 = vpop.f32.mrf.mxu0 }
  0xe7   :  { %232 = vrot.lane.b32.xlu0 %v2946_v18, %s3319_s18  ;;  %234 = vrot.lane.b32.xlu1 %v217_v22, %s3319_s18 }
  0xeb   :  { %236 = vrot.lane.b32.xlu1 %v2949_v21, %s3319_s18  ;;  %264 = vperm.xlu0 %3169, %v3496_v23  }
  0xef   :  { %259 = vperm.xlu1 %3170, %v3503_v24   ;;  %254 = vperm.xlu0 %3169, %v3508_v25  }
  0xf3   :  { %3171 = vset.pattern.permute.xlu1 %v3320_v27  ;;  %249 = vperm.xlu0 %3169, %v3515_v26  }
  0xf4   :  { %386 = vperm.xlu1 %3171, %v3496_v23  }
  0xf7   :  { %3172 = vset.pattern.permute.xlu0 %v3321_v28 }
  0xf8   :  { %382 = vperm.xlu1 %3171, %v3503_v24   ;;  %414 = vperm.xlu0 %3172, %v3496_v23  }
  0xfc   :  { %378 = vperm.xlu1 %3171, %v3508_v25   ;;  %406 = vperm.xlu0 %3172, %v3508_v25  }
 0x100   :  { %374 = vperm.xlu1 %3171, %v3515_v26   ;;  %3175 = vset.pattern.permute.xlu0 %v3322_v37 }
 0x104   :  { %3173 = vset.pattern.permute.xlu1 %v3321_v28 }
 0x105   :  { %410 = vperm.xlu1 %3173, %v3503_v24  }
 0x109   :  { %402 = vperm.xlu1 %3173, %v3515_v26  }
 0x10d   :  { %3174 = vset.pattern.permute.xlu1 %v3322_v37 }
 0x155   :  { %v231_v29 = vpop.permute.xlu0 %230 }
 0x156   :  { %v243_v30 = vsel %vm242_vm1, %v187_v15, %v231_v29  ;;  %v3323_v29 = vmov 4  }
 0x157   :  { %2954 = vmatprep.mubr.msk.f32.mxu1 %vm275_vm2, %v243_v30 }
 0x159   :  { %v233_v31 = vpop.permute.xlu0 %232  ;;  %v235_v32 = vpop.permute.xlu1 %234 }
 0x15a   :  { %v244_v33 = vsel %vm242_vm1, %v2940_v14, %v233_v31  ;;  %v245_v34 = vsel %vm242_vm1, %v197_v17, %v235_v32 }
 0x15b   :  { %2955 = vmatmul.mubr.msk.f32.vlgmr.msra.gmra.mxu1 %vm275_vm2, %v244_v33 }
 0x15c   :  { %2957 = vmatprep.mubr.msk.f32.mxu1 %vm275_vm2, %v245_v34 }
 0x15d   :  { %v237_v35 = vpop.permute.xlu1 %236 }
 0x15e   :  { %v246_v36 = vsel %vm242_vm1, %v2943_v16, %v237_v35 }
 0x15f   :  { %2958 = vmatmul.mubr.msk.f32.gmra.mxu1 %vm275_vm2, %v246_v36 }
 0x166   :  { %v265_v40 = vpop.permute.xlu0 %264 }
 0x167   :  { %v274_v52 = vmul.f32 %v3542_v45, %v265_v40 }
 0x16a   :  { %v260_v38 = vpop.permute.xlu1 %259  ;;  %v255_v42 = vpop.permute.xlu0 %254 }
 0x16b   :  { %v272_v47 = vmul.f32 %v3542_v45, %v255_v42  ;;  %v273_v54 = vmul.f32 %v3542_v45, %v260_v38 }
 0x16e   :  { %v250_v44 = vpop.permute.xlu0 %249 }
 0x16f   :  { %v387_v39 = vpop.permute.xlu1 %386  ;;  %v271_v58 = vmul.f32 %v3542_v45, %v250_v44 }
 0x170   :  { %v396_v56 = vmul.f32 %v3548_v49, %v387_v39 }
 0x173   :  { %v383_v41 = vpop.permute.xlu1 %382  ;;  %v415_v50 = vpop.permute.xlu0 %414 }
 0x174   :  { %v395_v60 = vmul.f32 %v3548_v49, %v383_v41 }
 0x177   :  { %v379_v43 = vpop.permute.xlu1 %378  ;;  %v407_v7 = vpop.permute.xlu0 %406 }
 0x178   :  { %v394_v57 = vmul.f32 %v3548_v49, %v379_v43 }
 0x17b   :  { %v375_v48 = vpop.permute.xlu1 %374 }
 0x17c   :  { %v393_v8 = vmul.f32 %v3548_v49, %v375_v48 }
 0x180   :  { %v411_v61 = vpop.permute.xlu1 %410 }
 0x184   :  { %v403_v17 = vpop.permute.xlu1 %402 }
 0x21b   :  { %v2956_v46 = vpop.f32.mrf.mxu1 }
 0x21c   :  { %v360_v53 = vadd.f32 %v2956_v46, %v272_v47 }
 0x21d   :  { %v354_v51 = vpop.f32.mrf.mxu1 }
 0x21e   :  { %v398_v63 = vadd.f32 %v394_v57, %v360_v53  ;;  %v355_v2 = vadd.f32 %v354_v51, %v271_v58  ;;  %v79_v53 = vld [vmem:[%s4176_s6] sm:$0xff] }
 0x21f   :  { %v2959_v55 = vpop.f32.mrf.mxu1  ;;  %2968 = vmatprep.mubr.msk.f32.mxu1 %vm96_vm0, %v79_v53 }
 0x220   :  { %v370_v59 = vadd.f32 %v2959_v55, %v274_v52  ;;  %v397_v11 = vadd.f32 %v393_v8, %v355_v2  ;;  %v418_v14 = vadd.f32 %v407_v7, %v398_v63  ;;  %v3325_v55 = vmov 8  }
 0x221   :  { %v364_v62 = vpop.f32.mrf.mxu1 }
 0x222   :  { %v400_v5 = vadd.f32 %v396_v56, %v370_v59  ;;  %v365_v6 = vadd.f32 %v364_v62, %v273_v54  ;;  %v417_v20 = vadd.f32 %v403_v17, %v397_v11  ;;  %v425_v21 = vsel %vm421_vm3, %v418_v14, 0.0 }
 0x223   :  { %v3324_v54 = vmov 5  }
 0x224   :  { %v399_v9 = vadd.f32 %v395_v60, %v365_v6  ;;  %v420_v10 = vadd.f32 %v415_v50, %v400_v5  ;;  %v422_v22 = vsel %vm421_vm3, %v417_v20, 0.0 }
 0x226   :  { %v431_v15 = vsel %vm421_vm3, %v420_v10, 0.0  ;;  %v419_v16 = vadd.f32 %v411_v61, %v399_v9 }
 0x227   :  { %432 = vadd.xlane.f32.xlu0 %v431_v15 }
 0x228   :  { %v428_v18 = vsel %vm421_vm3, %v419_v16, 0.0 }
 0x229   :  { %429 = vadd.xlane.f32.xlu1 %v428_v18 }
 0x22b   :  { %426 = vadd.xlane.f32.xlu0 %v425_v21 }
 0x22f   :  { %423 = vadd.xlane.f32.xlu0 %v422_v22 }
 0x23a   :  { %488 = vperm.xlu1 %3174, %v3496_v23  }
 0x23e   :  { %3176 = vset.pattern.permute.xlu1 %v3323_v29 }
 0x2b0   :  { %v433_v30 = vpop.xlane.xlu0 %432 }
 0x2b1   :  { %v438_v31 = vmul.f32 0.017857144, %v433_v30 }
 0x2b2   :  { %v430_v32 = vpop.xlane.xlu1 %429 }
 0x2b3   :  { %v3563_v35 = vsub.f32 %v420_v10, %v438_v31  ;;  %v437_v36 = vmul.f32 0.017857144, %v430_v32 }
 0x2b4   :  { %v427_v33 = vpop.xlane.xlu0 %426 }
 0x2b5   :  { %v436_v34 = vmul.f32 0.017857144, %v427_v33  ;;  %v3569_v42 = vsub.f32 %v419_v16, %v437_v36  ;;  %v446_v46 = vmul.f32 %v3563_v35, %v3563_v35 }
 0x2b6   :  { %v489_v56 = vpop.permute.xlu1 %488 }
 0x2b7   :  { %v3565_v38 = vsub.f32 %v418_v14, %v436_v34  ;;  %v456_v48 = vsel %vm421_vm3, %v446_v46, 0.0  ;;  %v445_v51 = vmul.f32 %v3569_v42, %v3569_v42 }
 0x2b8   :  { %v424_v39 = vpop.xlane.xlu0 %423 }
 0x2b9   :  { %v435_v40 = vmul.f32 0.017857144, %v424_v39  ;;  %v444_v41 = vmul.f32 %v3565_v38, %v3565_v38  ;;  %v453_v52 = vsel %vm421_vm3, %v445_v51, 0.0 }
 0x2bb   :  { %v3571_v43 = vsub.f32 %v417_v20, %v435_v40  ;;  %v450_v44 = vsel %vm421_vm3, %v444_v41, 0.0 }
 0x2bc   :  { %451 = vadd.xlane.f32.xlu1 %v450_v44 }
 0x2bd   :  { %v443_v47 = vmul.f32 %v3571_v43, %v3571_v43 }
 0x2bf   :  { %v447_v50 = vsel %vm421_vm3, %v443_v47, 0.0 }
 0x2c0   :  { %457 = vadd.xlane.f32.xlu1 %v456_v48  ;;  %448 = vadd.xlane.f32.xlu0 %v447_v50 }
 0x2c4   :  { %454 = vadd.xlane.f32.xlu0 %v453_v52 }
 0x2d1   :  { %508 = vperm.xlu1 %3176, %v3496_v23  }
 0x2d5   :  { %3177 = vset.pattern.permute.xlu1 %v3322_v37 }
 0x2d6   :  { %480 = vperm.xlu1 %3177, %v3508_v25  }
 0x2da   :  { %3178 = vset.pattern.permute.xlu1 %v3323_v29  ;;  %484 = vperm.xlu0 %3175, %v3503_v24  }
 0x2db   :  { %504 = vperm.xlu1 %3178, %v3503_v24  }
 0x2de   :  { %3182 = vset.pattern.permute.xlu0 %v3324_v54 }
 0x2df   :  { %3179 = vset.pattern.permute.xlu1 %v3322_v37  ;;  %524 = vperm.xlu0 %3182, %v3503_v24  }
 0x2e0   :  { %476 = vperm.xlu1 %3179, %v3515_v26  }
 0x2e3   :  { %528 = vperm.xlu0 %3182, %v3496_v23  }
 0x2e4   :  { %3180 = vset.pattern.permute.xlu1 %v3323_v29 }
 0x2e5   :  { %500 = vperm.xlu1 %3180, %v3508_v25  }
 0x2e7   :  { %3184 = vset.pattern.permute.xlu0 %v3325_v55 }
 0x2e8   :  { %641 = vperm.xlu0 %3184, %v3496_v23  }
 0x2e9   :  { %496 = vperm.xlu1 %3180, %v3515_v26  }
 0x2ed   :  { %3181 = vset.pattern.permute.xlu1 %v3324_v54 }
 0x2ee   :  { %516 = vperm.xlu1 %3181, %v3515_v26  }
 0x2f2   :  { %520 = vperm.xlu1 %3181, %v3508_v25  }
 0x2f6   :  { %3183 = vset.pattern.permute.xlu1 %v3325_v55 }
 0x2f7   :  { %629 = vperm.xlu1 %3183, %v3515_v26  }
 0x2fb   :  { %633 = vperm.xlu1 %3183, %v3508_v25  }
 0x2ff   :  { %637 = vperm.xlu1 %3183, %v3503_v24  }
 0x345   :  { %v452_v57 = vpop.xlane.xlu1 %451 }
 0x346   :  { %v460_v58 = vmul.f32 0.017857144, %v452_v57 }
 0x348   :  { %v464_v63 = vadd.f32 1e-05, %v460_v58 }
 0x349   :  { %v449_v59 = vpop.xlane.xlu0 %448  ;;  %v458_v60 = vpop.xlane.xlu1 %457 }
 0x34a   :  { %v459_v61 = vmul.f32 0.017857144, %v449_v59  ;;  %v462_v62 = vmul.f32 0.017857144, %v458_v60 }
 0x34c   :  { %v466_v2 = vadd.f32 1e-05, %v462_v62  ;;  %v463_v5 = vadd.f32 1e-05, %v459_v61 }
 0x34d   :  { %v455_v6 = vpop.xlane.xlu0 %454  ;;  %v509_v7 = vpop.permute.xlu1 %508 }
 0x34e   :  { %v461_v8 = vmul.f32 0.017857144, %v455_v6  ;;  %3237 = vrsqrt.f32 %v466_v2 }
 0x34f   :  { %3239 = vrsqrt.f32 %v464_v63 }
 0x350   :  { %v465_v9 = vadd.f32 1e-05, %v461_v8  ;;  %3241 = vrsqrt.f32 %v463_v5 }
 0x351   :  { %v481_v10 = vpop.permute.xlu1 %480 }
 0x352   :  { %3243 = vrsqrt.f32 %v465_v9 }
 0x355   :  { %v485_v22 = vpop.permute.xlu0 %484 }
 0x356   :  { %v505_v11 = vpop.permute.xlu1 %504 }
 0x35a   :  { %v525_v50 = vpop.permute.xlu0 %524 }
 0x35b   :  { %v477_v14 = vpop.permute.xlu1 %476  ;;  %v3238_v15 = vpop.eup %3237 }
 0x35c   :  { %v3240_v16 = vpop.eup %3239  ;;  %v474_v17 = vmul.f32 %v3238_v15, %v3563_v35 }
 0x35d   :  { %v3242_v18 = vpop.eup %3241  ;;  %v472_v30 = vmul.f32 %v3240_v16, %v3565_v38  ;;  %v80_v38 = vld [vmem:[%s4176_s6 + $0x8] sm:$0xff] }
 0x35e   :  { %v494_v21 = vmul.f32 %v489_v56, %v474_v17  ;;  %v471_v34 = vmul.f32 %v3242_v18, %v3571_v43  ;;  %v82_v43 = vld [vmem:[%s4176_s6 + $0x18] sm:$0xff]  ;;  %v529_v53 = vpop.permute.xlu0 %528 }
 0x35f   :  { %v3244_v20 = vpop.eup %3243  ;;  %v492_v39 = vmul.f32 %v481_v10, %v472_v30 }
 0x360   :  { %v501_v31 = vpop.permute.xlu1 %500  ;;  %v473_v32 = vmul.f32 %v3244_v20, %v3569_v42  ;;  %v514_v33 = vadd.f32 %v509_v7, %v494_v21  ;;  %v491_v44 = vmul.f32 %v477_v14, %v471_v34  ;;  %v81_v42 = vld [vmem:[%s4176_s6 + $0x10] sm:$0xff] }
 0x361   :  { %v512_v35 = vadd.f32 %v501_v31, %v492_v39 }
 0x362   :  { %v493_v36 = vmul.f32 %v485_v22, %v473_v32  ;;  %2960 = vmatprep.subr.mxu1 %v514_v33  ;;  %v661_v32 = vstv %s95_s22 }
 0x363   :  { %2961 = vmatpush3.msra.mxu1 %v514_v33  ;;  %v642_v2 = vpop.permute.xlu0 %641 }
 0x364   :  { %v513_v40 = vadd.f32 %v505_v11, %v493_v36  ;;  %v497_v41 = vpop.permute.xlu1 %496 }
 0x365   :  { %v511_v46 = vadd.f32 %v497_v41, %v491_v44 }
 0x366   :  { %2962 = vmatprep.subr.mxu1 %v513_v40 }
 0x367   :  { %2963 = vmatpush3.msra.mxu1 %v513_v40 }
 0x368   :  { %2964 = vmatprep.subr.mxu1 %v512_v35 }
 0x369   :  { %2965 = vmatpush3.msra.mxu1 %v512_v35  ;;  %v517_v47 = vpop.permute.xlu1 %516 }
 0x36a   :  { %2966 = vmatprep.subr.mxu1 %v511_v46 }
 0x36b   :  { %2967 = vmatpush3.msra.mxu1 %v511_v46 }
 0x36c   :  { %2969 = vmatmul.mubr.msk.f32.vlgmr.msra.gmra.mxu1 %vm96_vm0, %v80_v38  ;;  %2974 = vmatprep.subr.msk.mxu1 %vm421_vm3, %v3484_v13 }
 0x36d   :  { %2971 = vmatprep.mubr.msk.f32.mxu1 %vm96_vm0, %v81_v42  ;;  %2975 = vmatpush3.xpose.msk.msra.mxu1 %vm421_vm3, %v3484_v13  ;;  %v521_v48 = vpop.permute.xlu1 %520  ;;  %v83_v42 = vld [vmem:[%s4177_s7] sm:$0xff] }
 0x36e   :  { %2998 = vmatprep.mubr.msk.f32.mxu0 %vm789_vm4, %v83_v42 }
 0x370   :  { %2972 = vmatmul.mubr.msk.f32.gmra.mxu1 %vm96_vm0, %v82_v43  ;;  %v3326_v43 = vmov 6  }
 0x371   :  { %3185 = vset.pattern.permute.xlu1 %v3326_v43  ;;  %3186 = vset.pattern.permute.xlu0 %v3326_v43 }
 0x372   :  { %v630_v51 = vpop.permute.xlu1 %629  ;;  %786 = vperm.xlu1 %3185, %v3496_v23   ;;  %778 = vperm.xlu0 %3186, %v3508_v25  }
 0x376   :  { %v634_v57 = vpop.permute.xlu1 %633  ;;  %782 = vperm.xlu1 %3185, %v3503_v24  }
 0x37a   :  { %v638_v8 = vpop.permute.xlu1 %637  ;;  %774 = vperm.xlu1 %3185, %v3515_v26  }
 0x42c   :  { %v2970_v52 = vpop.f32.mrf.mxu1 }
 0x42d   :  { %v615_v56 = vadd.f32 %v2970_v52, %v521_v48  ;;  %v84_v52 = vld [vmem:[%s4177_s7 + $0x8] sm:$0xff] }
 0x42e   :  { %v609_v58 = vpop.f32.mrf.mxu1 }
 0x42f   :  { %v610_v59 = vadd.f32 %v609_v58, %v517_v47  ;;  %v645_v61 = vmul.f32 %v634_v57, %v615_v56  ;;  %v87_v57 = vld [vmem:[%s4178_s8] sm:$0xff]  ;;  %v3327_v58 = vmov 7  }
 0x430   :  { %v2973_v60 = vpop.f32.mrf.mxu1  ;;  %3187 = vset.pattern.permute.xlu1 %v3327_v58  ;;  %3188 = vset.pattern.permute.xlu0 %v3327_v58 }
 0x431   :  { %v644_v62 = vmul.f32 %v630_v51, %v610_v59  ;;  %v625_v63 = vadd.f32 %v2973_v60, %v529_v53  ;;  %v649_v9 = vsel %vm421_vm3, %v645_v61, 0.0  ;;  %v85_v53 = vld [vmem:[%s4177_s7 + $0x10] sm:$0xff]  ;;  %1001 = vperm.xlu1 %3187, %v3496_v23   ;;  %997 = vperm.xlu0 %3188, %v3503_v24  }
 0x432   :  { %v619_v5 = vpop.f32.mrf.mxu1 }
 0x433   :  { %v648_v6 = vsel %vm421_vm3, %v644_v62, 0.0  ;;  %v620_v7 = vadd.f32 %v619_v5, %v525_v50  ;;  %v647_v10 = vmul.f32 %v642_v2, %v625_v63  ;;  %v779_v5 = vpop.permute.xlu0 %778 }
 0x434   :  { %v650_v14 = vadd.f32 %v649_v9, %v648_v6  ;;  %v90_v9 = vld [vmem:[%s4178_s8 + $0x18] sm:$0xff] }
 0x435   :  { %v646_v11 = vmul.f32 %v638_v8, %v620_v7  ;;  %v653_v17 = vsel %vm421_vm3, %v647_v10, 0.0  ;;  %993 = vperm.xlu1 %3187, %v3508_v25   ;;  %3189 = vset.pattern.permute.xlu0 %v3318_v19  ;;  %v89_v8 = vld [vmem:[%s4178_s8 + $0x10] sm:$0xff]  ;;  %v2727_v10 = vld [vmem:[%s4175_s5 + $0x40] sm:$0xff] }
 0x437   :  { %v651_v15 = vsel %vm421_vm3, %v646_v11, 0.0 }
 0x438   :  { %v652_v16 = vadd.f32 %v651_v15, %v650_v14 }
 0x439   :  { %989 = vperm.xlu1 %3187, %v3515_v26   ;;  %v88_v26 = vld [vmem:[%s4178_s8 + $0x8] sm:$0xff] }
 0x43a   :  { %v654_v18 = vadd.f32 %v653_v17, %v652_v16 }
 0x43c   :  { %v655_v20 = vrot.slane %v654_v18, 4 }
 0x43d   :  { %3190 = vset.pattern.permute.xlu1 %v3318_v19 }
 0x43e   :  { %v656_v21 = vadd.f32 %v655_v20, %v654_v18 }
 0x440   :  { %v657_v22 = vrot.slane %v656_v21, 2 }
 0x442   :  { %v658_v30 = vadd.f32 %v657_v22, %v656_v21 }
 0x444   :  { %v659_v31 = vrot.slane %v658_v30, 1 }
 0x446   :  { %v660_v33 = vadd.f32 %v659_v31, %v658_v30 }
 0x448   :  { %v662_v34 = vadd.f32 %v661_v32, %v660_v33 }
 0x44a   :  { %v2713_v36 = vmul.f32 -1.442695, %v662_v34 }
 0x44c   :  { %3245 = vpow2.f32 %v2713_v36  ;;  %v2731_v36 = vld [vmem:[%s4175_s5 + $0x60] sm:$0xff] }
 0x459   :  { %v3246_v39 = vpop.eup %3245 }
 0x45a   :  { %v666_v40 = vadd.f32 1.0, %v3246_v39  ;;  %v2732_v39 = vld [vmem:[%s4175_s5 + $0x68] sm:$0xff] }
 0x45c   :  { %3247 = vrcp.f32 %v666_v40  ;;  %v2733_v40 = vld [vmem:[%s4175_s5 + $0x70] sm:$0xff] }
 0x469   :  { %v3248_v41 = vpop.eup %3247 }
 0x46a   :  { %v669_v44 = vmul.f32 %v3248_v41, %v610_v59  ;;  %v670_v35 = vmul.f32 %v3248_v41, %v615_v56  ;;  %v671_v46 = vmul.f32 %v3248_v41, %v620_v7  ;;  %v672_v38 = vmul.f32 %v3248_v41, %v625_v63  ;;  %v86_v56 = vld [vmem:[%s4177_s7 + $0x18] sm:$0xff]  ;;  %v787_v59 = vpop.permute.xlu1 %786 }
 0x46c   :  { %2976 = vmatprep.mubr.msk.f32.mxu1 %vm421_vm3, %v669_v44 }
 0x46d   :  { %2977 = vmatmul.mubr.msk.f32.vlgmr.msra.gmra.mxu1 %vm421_vm3, %v670_v35 }
 0x46e   :  { %2979 = vmatprep.mubr.msk.f32.mxu1 %vm421_vm3, %v671_v46  ;;  %v783_v61 = vpop.permute.xlu1 %782 }
 0x471   :  { %2980 = vmatmul.mubr.msk.f32.gmra.mxu1 %vm421_vm3, %v672_v38 }
 0x472   :  { %3012 = vmatprep.mubr.msk.f32.mxu1 %vm96_vm0, %v87_v57  ;;  %v775_v23 = vpop.permute.xlu1 %774 }
 0x4ac   :  { %v1002_v11 = vpop.permute.xlu1 %1001  ;;  %v998_v20 = vpop.permute.xlu0 %997 }
 0x4b0   :  { %v994_v16 = vpop.permute.xlu1 %993 }
 0x4b4   :  { %v990_v33 = vpop.permute.xlu1 %989 }
 0x52d   :  { %v2978_v47 = vpop.f32.mrf.mxu1 }
 0x52f   :  { %v754_v48 = vpop.f32.mrf.mxu1 }
 0x531   :  { %v2981_v50 = vpop.f32.mrf.mxu1 }
 0x532   :  { %2982 = vmatprep.subr.mxu0 %v2981_v50 }
 0x533   :  { %v764_v51 = vpop.f32.mrf.mxu1  ;;  %2983 = vmatpush3.msra.mxu0 %v2981_v50  ;;  %v3758_v50 = vld [vmem:[%s4179_s9 + $0x30] sm:$0xff] }
 0x534   :  { %2984 = vmatprep.subr.mxu0 %v764_v51 }
 0x535   :  { %2985 = vmatpush3.msra.mxu0 %v764_v51  ;;  %v3765_v51 = vld [vmem:[%s4179_s9 + $0x38] sm:$0xff] }
 0x536   :  { %2986 = vmatprep.subr.mxu0 %v2978_v47 }
 0x537   :  { %2987 = vmatpush3.msra.mxu0 %v2978_v47 }
 0x538   :  { %2988 = vmatprep.subr.mxu0 %v754_v48 }
 0x539   :  { %2989 = vmatpush3.msra.mxu0 %v754_v48 }
 0x53a   :  { %2990 = vmatprep.subr.mxu0 %v3417_v0 }
 0x53b   :  { %2991 = vmatpush3.msra.mxu0 %v3417_v0 }
 0x53c   :  { %2992 = vmatprep.subr.mxu0 %v3422_v1 }
 0x53d   :  { %2993 = vmatpush3.msra.mxu0 %v3422_v1 }
 0x53e   :  { %2994 = vmatprep.subr.mxu0 %v3432_v3 }
 0x53f   :  { %2995 = vmatpush3.msra.mxu0 %v3432_v3 }
 0x540   :  { %2996 = vmatprep.subr.mxu0 %v3440_v4 }
 0x541   :  { %2997 = vmatpush3.msra.mxu0 %v3440_v4 }
 0x542   :  { %2999 = vmatmul.mubr.msk.f32.vlgmr.msra.gmra.mxu0 %vm789_vm4, %v84_v52  ;;  %v3771_v52 = vld [vmem:[%s4179_s9 + $0x28] sm:$0xff] }
 0x543   :  { %3001 = vmatprep.mubr.msk.f32.mxu0 %vm789_vm4, %v85_v53  ;;  %v3779_v53 = vld [vmem:[%s4179_s9 + $0x20] sm:$0xff] }
 0x546   :  { %3002 = vmatmul.mubr.msk.f32.gmra.mxu0 %vm789_vm4, %v86_v56 }
 0x547   :  { %3026 = vmatprep.mubr.msk.f32.mxu0 %vm96_vm0, %v2727_v10 }
 0x602   :  { %v3000_v60 = vpop.f32.mrf.mxu0 }
 0x603   :  { %v874_v24 = vadd.f32 %v3000_v60, %v779_v5 }
 0x604   :  { %v868_v62 = vpop.f32.mrf.mxu0 }
 0x605   :  { %v869_v25 = vadd.f32 %v868_v62, %v775_v23 }
 0x606   :  { %v3003_v63 = vpop.f32.mrf.mxu0 }
 0x607   :  { %v884_v2 = vadd.f32 %v3003_v63, %v787_v59 }
 0x608   :  { %v878_v6 = vpop.f32.mrf.mxu0 }
 0x609   :  { %v879_v7 = vadd.f32 %v878_v6, %v783_v61  ;;  %3004 = vmatprep.subr.mxu1 %v884_v2 }
 0x60a   :  { %3005 = vmatpush3.msra.mxu1 %v884_v2 }
 0x60b   :  { %3006 = vmatprep.subr.mxu1 %v879_v7 }
 0x60c   :  { %3007 = vmatpush3.msra.mxu1 %v879_v7 }
 0x60d   :  { %3008 = vmatprep.subr.mxu1 %v874_v24 }
 0x60e   :  { %3009 = vmatpush3.msra.mxu1 %v874_v24 }
 0x60f   :  { %3010 = vmatprep.subr.mxu1 %v869_v25 }
 0x610   :  { %3011 = vmatpush3.msra.mxu1 %v869_v25 }
 0x611   :  { %3013 = vmatmul.mubr.msk.f32.vlgmr.msra.gmra.mxu1 %vm96_vm0, %v88_v26  ;;  %3038 = vmatprep.subr.mxu1 %v3477_v12 }
 0x612   :  { %3015 = vmatprep.mubr.msk.f32.mxu1 %vm96_vm0, %v89_v8  ;;  %3039 = vmatpush3.msra.mxu1 %v3477_v12 }
 0x613   :  { %3040 = vmatprep.subr.mxu1 %v3484_v13 }
 0x614   :  { %3041 = vmatpush3.msra.mxu1 %v3484_v13 }
 0x615   :  { %3016 = vmatmul.mubr.msk.f32.gmra.mxu1 %vm96_vm0, %v90_v9 }
 0x6d1   :  { %v3014_v14 = vpop.f32.mrf.mxu1 }
 0x6d2   :  { %v985_v21 = vadd.f32 %v3014_v14, %v3432_v3  ;;  %v2729_v3 = vld [vmem:[%s4175_s5 + $0x50] sm:$0xff] }
 0x6d3   :  { %v965_v15 = vpop.f32.mrf.mxu1 }
 0x6d4   :  { %v984_v31 = vadd.f32 %v965_v15, %v3440_v4  ;;  %v3710_v34 = vadd.f32 %v994_v16, %v985_v21  ;;  %v2730_v4 = vld [vmem:[%s4175_s5 + $0x58] sm:$0xff] }
 0x6d5   :  { %v3017_v17 = vpop.f32.mrf.mxu1 }
 0x6d6   :  { %v987_v18 = vadd.f32 %v3017_v17, %v3417_v0  ;;  %v3714_v0 = vadd.f32 %v990_v33, %v984_v31 }
 0x6d7   :  { %v975_v12 = vpop.f32.mrf.mxu1 }
 0x6d8   :  { %v3702_v22 = vadd.f32 %v1002_v11, %v987_v18  ;;  %v986_v30 = vadd.f32 %v975_v12, %v3422_v1  ;;  %v2728_v1 = vld [vmem:[%s4175_s5 + $0x48] sm:$0xff] }
 0x6da   :  { %v3706_v32 = vadd.f32 %v998_v20, %v986_v30  ;;  %3018 = vmatprep.subr.mxu0 %v3702_v22 }
 0x6db   :  { %3019 = vmatpush3.msra.mxu0 %v3702_v22 }
 0x6dc   :  { %3020 = vmatprep.subr.mxu0 %v3706_v32 }
 0x6dd   :  { %3021 = vmatpush3.msra.mxu0 %v3706_v32 }
 0x6de   :  { %3022 = vmatprep.subr.mxu0 %v3710_v34 }
 0x6df   :  { %3023 = vmatpush3.msra.mxu0 %v3710_v34 }
 0x6e0   :  { %3024 = vmatprep.subr.mxu0 %v3714_v0 }
 0x6e1   :  { %3025 = vmatpush3.msra.mxu0 %v3714_v0 }
 0x6e2   :  { %3027 = vmatmul.mubr.msk.f32.vlgmr.msra.gmra.mxu0 %vm96_vm0, %v2728_v1  ;;  %3062 = vmatprep.subr.msk.mxu0 %vm421_vm3, %v3484_v13 }
 0x6e3   :  { %3029 = vmatprep.mubr.msk.f32.mxu0 %vm96_vm0, %v2729_v3  ;;  %3063 = vmatpush3.xpose.msk.msra.mxu0 %vm421_vm3, %v3484_v13  ;;  %v2734_v13 = vld [vmem:[%s4175_s5 + $0x78] sm:$0xff] }
 0x6e6   :  { %3030 = vmatmul.mubr.msk.f32.gmra.mxu0 %vm96_vm0, %v2730_v4 }
 0x6e7   :  { %3032 = vmatprep.mubr.msk.f32.mxu0 %vm96_vm0, %v2731_v36 }
 0x6ea   :  { %3033 = vmatmul.mubr.msk.f32.gmra.mxu0 %vm96_vm0, %v2732_v39 }
 0x6eb   :  { %3035 = vmatprep.mubr.msk.f32.mxu0 %vm96_vm0, %v2733_v40 }
 0x6ee   :  { %3036 = vmatmul.mubr.msk.f32.gmra.mxu0 %vm96_vm0, %v2734_v13 }
 0x7a2   :  { %v3028_v41 = vpop.f32.mrf.mxu0 }
 0x7a4   :  { %v1128_v44 = vpop.f32.mrf.mxu0 }
 0x7a6   :  { %v3031_v35 = vpop.f32.mrf.mxu0 }
 0x7a8   :  { %v1138_v46 = vpop.f32.mrf.mxu0 }
 0x7aa   :  { %v3034_v38 = vpop.f32.mrf.mxu0 }
 0x7ab   :  { %1173 = vrot.lane.b32.xlu1 %v3034_v38, %s3319_s18 }
 0x7ac   :  { %v1148_v42 = vpop.f32.mrf.mxu0 }
 0x7ad   :  { %1171 = vrot.lane.b32.xlu0 %v1148_v42, %s3319_s18 }
 0x7ae   :  { %v3037_v47 = vpop.f32.mrf.mxu0 }
 0x7af   :  { %1177 = vrot.lane.b32.xlu1 %v3037_v47, %s3319_s18 }
 0x7b0   :  { %v1158_v48 = vpop.f32.mrf.mxu0 }
 0x7b1   :  { %1175 = vrot.lane.b32.xlu0 %v1158_v48, %s3319_s18 }
 0x7b3   :  { %1199 = vperm.xlu1 %3190, %v3758_v50  }
 0x7b5   :  { %1204 = vperm.xlu0 %3189, %v3765_v51  }
 0x7b7   :  { %3191 = vset.pattern.permute.xlu1 %v3320_v27 }
 0x7b8   :  { %1321 = vperm.xlu1 %3191, %v3765_v51  }
 0x7b9   :  { %1194 = vperm.xlu0 %3189, %v3771_v52  }
 0x7bc   :  { %1317 = vperm.xlu1 %3191, %v3758_v50  }
 0x7bd   :  { %1189 = vperm.xlu0 %3189, %v3779_v53  }
 0x7c0   :  { %1313 = vperm.xlu1 %3191, %v3771_v52  }
 0x7c1   :  { %3192 = vset.pattern.permute.xlu0 %v3321_v28 }
 0x7c2   :  { %1345 = vperm.xlu0 %3192, %v3765_v51  }
 0x7c4   :  { %1309 = vperm.xlu1 %3191, %v3779_v53  }
 0x7c6   :  { %1337 = vperm.xlu0 %3192, %v3771_v52  }
 0x7c8   :  { %3193 = vset.pattern.permute.xlu1 %v3321_v28 }
 0x7c9   :  { %1341 = vperm.xlu1 %3193, %v3758_v50  }
 0x7ca   :  { %3195 = vset.pattern.permute.xlu0 %v3322_v37 }
 0x7cd   :  { %1333 = vperm.xlu1 %3193, %v3779_v53  }
 0x7d1   :  { %3194 = vset.pattern.permute.xlu1 %v3322_v37 }
 0x81d   :  { %v1174_v56 = vpop.permute.xlu1 %1173 }
 0x81e   :  { %v1184_v60 = vsel %vm242_vm1, %v3028_v41, %v1174_v56 }
 0x81f   :  { %v1172_v57 = vpop.permute.xlu0 %1171 }
 0x820   :  { %v1183_v59 = vsel %vm242_vm1, %v1128_v44, %v1172_v57 }
 0x821   :  { %3042 = vmatprep.mubr.msk.f32.mxu1 %vm275_vm2, %v1183_v59  ;;  %v1178_v61 = vpop.permute.xlu1 %1177 }
 0x822   :  { %3043 = vmatmul.mubr.msk.f32.vlgmr.msra.gmra.mxu1 %vm275_vm2, %v1184_v60  ;;  %v1186_v2 = vsel %vm242_vm1, %v3031_v35, %v1178_v61 }
 0x823   :  { %v1176_v62 = vpop.permute.xlu0 %1175 }
 0x824   :  { %v1185_v63 = vsel %vm242_vm1, %v1138_v46, %v1176_v62 }
 0x825   :  { %3045 = vmatprep.mubr.msk.f32.mxu1 %vm275_vm2, %v1185_v63 }
 0x826   :  { %3046 = vmatmul.mubr.msk.f32.gmra.mxu1 %vm275_vm2, %v1186_v2 }
 0x82e   :  { %v1200_v5 = vpop.permute.xlu1 %1199 }
 0x82f   :  { %v1209_v17 = vmul.f32 %v3542_v45, %v1200_v5 }
 0x830   :  { %v1205_v7 = vpop.permute.xlu0 %1204 }
 0x831   :  { %v1210_v15 = vmul.f32 %v3542_v45, %v1205_v7 }
 0x833   :  { %v1322_v6 = vpop.permute.xlu1 %1321 }
 0x834   :  { %v1195_v24 = vpop.permute.xlu0 %1194  ;;  %v1327_v12 = vmul.f32 %v3548_v49, %v1322_v6 }
 0x835   :  { %v1208_v9 = vmul.f32 %v3542_v45, %v1195_v24 }
 0x837   :  { %v1318_v23 = vpop.permute.xlu1 %1317 }
 0x838   :  { %v1190_v26 = vpop.permute.xlu0 %1189  ;;  %v1326_v31 = vmul.f32 %v3548_v49, %v1318_v23 }
 0x839   :  { %v1207_v21 = vmul.f32 %v3542_v45, %v1190_v26 }
 0x83b   :  { %v1314_v25 = vpop.permute.xlu1 %1313 }
 0x83c   :  { %v1325_v20 = vmul.f32 %v3548_v49, %v1314_v25 }
 0x83d   :  { %v1346_v11 = vpop.permute.xlu0 %1345 }
 0x83f   :  { %v1310_v10 = vpop.permute.xlu1 %1309 }
 0x840   :  { %v1324_v13 = vmul.f32 %v3548_v49, %v1310_v10 }
 0x841   :  { %v1338_v40 = vpop.permute.xlu0 %1337 }
 0x844   :  { %v1342_v33 = vpop.permute.xlu1 %1341 }
 0x848   :  { %v1334_v45 = vpop.permute.xlu1 %1333 }
 0x8e2   :  { %v3044_v8 = vpop.f32.mrf.mxu1 }
 0x8e3   :  { %v1295_v16 = vadd.f32 %v3044_v8, %v1208_v9 }
 0x8e4   :  { %v1289_v14 = vpop.f32.mrf.mxu1 }
 0x8e5   :  { %v1290_v3 = vadd.f32 %v1289_v14, %v1207_v21  ;;  %v1329_v36 = vadd.f32 %v1325_v20, %v1295_v16  ;;  %v2735_v16 = vld [vmem:[%s4176_s6 + $0x20] sm:$0xff] }
 0x8e6   :  { %v3047_v18 = vpop.f32.mrf.mxu1  ;;  %3056 = vmatprep.mubr.msk.f32.mxu1 %vm96_vm0, %v2735_v16 }
 0x8e7   :  { %v1305_v30 = vadd.f32 %v3047_v18, %v1210_v15  ;;  %v1328_v35 = vadd.f32 %v1324_v13, %v1290_v3  ;;  %v1349_v46 = vadd.f32 %v1338_v40, %v1329_v36 }
 0x8e8   :  { %v1299_v1 = vpop.f32.mrf.mxu1 }
 0x8e9   :  { %v1331_v4 = vadd.f32 %v1327_v12, %v1305_v30  ;;  %v1300_v39 = vadd.f32 %v1299_v1, %v1209_v17  ;;  %v1348_v48 = vadd.f32 %v1334_v45, %v1328_v35  ;;  %v1355_v56 = vsel %vm421_vm3, %v1349_v46, 0.0 }
 0x8eb   :  { %v1330_v41 = vadd.f32 %v1326_v31, %v1300_v39  ;;  %v1351_v44 = vadd.f32 %v1346_v11, %v1331_v4  ;;  %v1352_v57 = vsel %vm421_vm3, %v1348_v48, 0.0 }
 0x8ed   :  { %v1361_v38 = vsel %vm421_vm3, %v1351_v44, 0.0  ;;  %v1350_v42 = vadd.f32 %v1342_v33, %v1330_v41 }
 0x8ee   :  { %1362 = vadd.xlane.f32.xlu0 %v1361_v38 }
 0x8ef   :  { %v1358_v47 = vsel %vm421_vm3, %v1350_v42, 0.0 }
 0x8f0   :  { %1359 = vadd.xlane.f32.xlu1 %v1358_v47 }
 0x8f2   :  { %1356 = vadd.xlane.f32.xlu0 %v1355_v56 }
 0x8f6   :  { %1353 = vadd.xlane.f32.xlu0 %v1352_v57 }
 0x901   :  { %1417 = vperm.xlu1 %3194, %v3765_v51  }
 0x905   :  { %3196 = vset.pattern.permute.xlu1 %v3323_v29 }
 0x977   :  { %v1363_v49 = vpop.xlane.xlu0 %1362 }
 0x978   :  { %v1367_v59 = vmul.f32 0.017857144, %v1363_v49 }
 0x979   :  { %v1360_v60 = vpop.xlane.xlu1 %1359 }
 0x97a   :  { %v3815_v63 = vsub.f32 %v1351_v44, %v1367_v59  ;;  %v1366_v2 = vmul.f32 0.017857144, %v1360_v60 }
 0x97b   :  { %v1357_v61 = vpop.xlane.xlu0 %1356 }
 0x97c   :  { %v1365_v62 = vmul.f32 0.017857144, %v1357_v61  ;;  %v3821_v24 = vsub.f32 %v1350_v42, %v1366_v2  ;;  %v1375_v8 = vmul.f32 %v3815_v63, %v3815_v63  ;;  %v2736_v2 = vld [vmem:[%s4176_s6 + $0x28] sm:$0xff] }
 0x97d   :  { %v1418_v17 = vpop.permute.xlu1 %1417 }
 0x97e   :  { %v3817_v5 = vsub.f32 %v1349_v46, %v1365_v62  ;;  %v1385_v10 = vsel %vm421_vm3, %v1375_v8, 0.0  ;;  %v1374_v14 = vmul.f32 %v3821_v24, %v3821_v24 }
 0x97f   :  { %v1354_v6 = vpop.xlane.xlu0 %1353 }
 0x980   :  { %v1364_v7 = vmul.f32 0.017857144, %v1354_v6  ;;  %v1373_v23 = vmul.f32 %v3817_v5, %v3817_v5  ;;  %v1382_v15 = vsel %vm421_vm3, %v1374_v14, 0.0  ;;  %v2738_v6 = vld [vmem:[%s4176_s6 + $0x38] sm:$0xff] }
 0x982   :  { %v3823_v25 = vsub.f32 %v1348_v48, %v1364_v7  ;;  %v1379_v26 = vsel %vm421_vm3, %v1373_v23, 0.0 }
 0x983   :  { %1380 = vadd.xlane.f32.xlu1 %v1379_v26 }
 0x984   :  { %v1372_v9 = vmul.f32 %v3823_v25, %v3823_v25 }
 0x986   :  { %v1376_v11 = vsel %vm421_vm3, %v1372_v9, 0.0 }
 0x987   :  { %1386 = vadd.xlane.f32.xlu1 %v1385_v10  ;;  %1377 = vadd.xlane.f32.xlu0 %v1376_v11 }
 0x98b   :  { %1383 = vadd.xlane.f32.xlu0 %v1382_v15 }
 0x998   :  { %1437 = vperm.xlu1 %3196, %v3765_v51  }
 0x99c   :  { %3197 = vset.pattern.permute.xlu1 %v3322_v37 }
 0x99d   :  { %1409 = vperm.xlu1 %3197, %v3771_v52  }
 0x9a1   :  { %3198 = vset.pattern.permute.xlu1 %v3323_v29  ;;  %1413 = vperm.xlu0 %3195, %v3758_v50  }
 0x9a2   :  { %1433 = vperm.xlu1 %3198, %v3758_v50  }
 0x9a5   :  { %3202 = vset.pattern.permute.xlu0 %v3324_v54 }
 0x9a6   :  { %3199 = vset.pattern.permute.xlu1 %v3322_v37  ;;  %1449 = vperm.xlu0 %3202, %v3771_v52  }
 0x9a7   :  { %1405 = vperm.xlu1 %3199, %v3779_v53  }
 0x9aa   :  { %3204 = vset.pattern.permute.xlu0 %v3325_v55 }
 0x9ab   :  { %3200 = vset.pattern.permute.xlu1 %v3323_v29  ;;  %1562 = vperm.xlu0 %3204, %v3771_v52  }
 0x9ac   :  { %1429 = vperm.xlu1 %3200, %v3771_v52  }
 0x9af   :  { %1570 = vperm.xlu0 %3204, %v3765_v51  }
 0x9b0   :  { %1425 = vperm.xlu1 %3200, %v3779_v53  }
 0x9b3   :  { %3208 = vset.pattern.permute.xlu0 %v3326_v43 }
 0x9b4   :  { %3201 = vset.pattern.permute.xlu1 %v3324_v54  ;;  %1708 = vperm.xlu0 %3208, %v3758_v50  }
 0x9b5   :  { %1445 = vperm.xlu1 %3201, %v3779_v53  }
 0x9b8   :  { %3209 = vset.pattern.permute.xlu0 %v3327_v58 }
 0x9b9   :  { %1453 = vperm.xlu1 %3201, %v3758_v50   ;;  %1926 = vperm.xlu0 %3209, %v3765_v51  }
 0x9bd   :  { %3203 = vset.pattern.permute.xlu1 %v3325_v55  ;;  %1914 = vperm.xlu0 %3209, %v3779_v53  }
 0x9be   :  { %1558 = vperm.xlu1 %3203, %v3779_v53  }
 0x9c1   :  { %3212 = vset.pattern.permute.xlu0 %v3318_v19 }
 0x9c2   :  { %3205 = vset.pattern.permute.xlu1 %v3324_v54 }
 0x9c3   :  { %1457 = vperm.xlu1 %3205, %v3765_v51  }
 0x9c7   :  { %3206 = vset.pattern.permute.xlu1 %v3325_v55 }
 0x9c8   :  { %1566 = vperm.xlu1 %3206, %v3758_v50  }
 0x9cc   :  { %3207 = vset.pattern.permute.xlu1 %v3326_v43 }
 0x9cd   :  { %1712 = vperm.xlu1 %3207, %v3765_v51  }
 0x9d1   :  { %1704 = vperm.xlu1 %3207, %v3771_v52  }
 0x9d5   :  { %1700 = vperm.xlu1 %3207, %v3779_v53  }
 0x9d9   :  { %3210 = vset.pattern.permute.xlu1 %v3327_v58 }
 0x9da   :  { %1922 = vperm.xlu1 %3210, %v3758_v50  }
 0x9de   :  { %1918 = vperm.xlu1 %3210, %v3771_v52  }
 0x9e2   :  { %3211 = vset.pattern.permute.xlu1 %v3318_v19 }
 0xa0c   :  { %v1381_v18 = vpop.xlane.xlu1 %1380 }
 0xa0d   :  { %v1389_v12 = vmul.f32 0.017857144, %v1381_v18 }
 0xa0f   :  { %v1393_v51 = vadd.f32 1e-05, %v1389_v12 }
 0xa10   :  { %v1387_v20 = vpop.xlane.xlu1 %1386  ;;  %v1378_v21 = vpop.xlane.xlu0 %1377 }
 0xa11   :  { %v1391_v30 = vmul.f32 0.017857144, %v1387_v20  ;;  %v1388_v31 = vmul.f32 0.017857144, %v1378_v21 }
 0xa13   :  { %v1395_v33 = vadd.f32 1e-05, %v1391_v30  ;;  %v1392_v1 = vadd.f32 1e-05, %v1388_v31 }
 0xa14   :  { %v1384_v3 = vpop.xlane.xlu0 %1383  ;;  %v1438_v53 = vpop.permute.xlu1 %1437 }
 0xa15   :  { %3249 = vrsqrt.f32 %v1395_v33  ;;  %v1390_v4 = vmul.f32 0.017857144, %v1384_v3 }
 0xa16   :  { %3251 = vrsqrt.f32 %v1393_v51 }
 0xa17   :  { %v1394_v50 = vadd.f32 1e-05, %v1390_v4  ;;  %3253 = vrsqrt.f32 %v1392_v1 }
 0xa18   :  { %v1410_v52 = vpop.permute.xlu1 %1409 }
 0xa19   :  { %3255 = vrsqrt.f32 %v1394_v50 }
 0xa1c   :  { %v1414_v38 = vpop.permute.xlu0 %1413 }
 0xa1d   :  { %v1434_v36 = vpop.permute.xlu1 %1433 }
 0xa22   :  { %v3250_v39 = vpop.eup %3249  ;;  %v1406_v40 = vpop.permute.xlu1 %1405 }
 0xa23   :  { %v1403_v13 = vmul.f32 %v3250_v39, %v3815_v63  ;;  %v3252_v41 = vpop.eup %3251 }
 0xa24   :  { %v3254_v44 = vpop.eup %3253  ;;  %v1401_v45 = vmul.f32 %v3252_v41, %v3817_v5  ;;  %v2737_v5 = vld [vmem:[%s4176_s6 + $0x30] sm:$0xff]  ;;  %s2751_s6 = sld [smem:[#allocation2 + $0x1]] }
 0xa25   :  { %v1423_v35 = vmul.f32 %v1418_v17, %v1403_v13  ;;  %v1400_v56 = vmul.f32 %v3254_v44, %v3823_v25 }
 0xa26   :  { %v3256_v46 = vpop.eup %3255  ;;  %v1421_v49 = vmul.f32 %v1410_v52, %v1401_v45 }
 0xa27   :  { %v1443_v42 = vadd.f32 %v1438_v53, %v1423_v35  ;;  %v1430_v47 = vpop.permute.xlu1 %1429  ;;  %v1402_v48 = vmul.f32 %v3256_v46, %v3821_v24  ;;  %v1420_v61 = vmul.f32 %v1406_v40, %v1400_v56  ;;  %v1450_v24 = vpop.permute.xlu0 %1449 }
 0xa28   :  { %v1441_v62 = vadd.f32 %v1430_v47, %v1421_v49 }
 0xa29   :  { %v1422_v57 = vmul.f32 %v1414_v38, %v1402_v48  ;;  %3048 = vmatprep.subr.mxu1 %v1443_v42 }
 0xa2a   :  { %3049 = vmatpush3.msra.mxu1 %v1443_v42  ;;  %v1590_v44 = vstv %s2751_s6 }
 0xa2b   :  { %v1442_v59 = vadd.f32 %v1434_v36, %v1422_v57  ;;  %v1426_v60 = vpop.permute.xlu1 %1425  ;;  %v1563_v26 = vpop.permute.xlu0 %1562 }
 0xa2c   :  { %v1440_v63 = vadd.f32 %v1426_v60, %v1420_v61 }
 0xa2d   :  { %3050 = vmatprep.subr.mxu1 %v1442_v59 }
 0xa2e   :  { %3051 = vmatpush3.msra.mxu1 %v1442_v59  ;;  %v2739_v59 = vld [vmem:[%s4177_s7 + $0x20] sm:$0xff] }
 0xa2f   :  { %3052 = vmatprep.subr.mxu1 %v1441_v62  ;;  %v1571_v12 = vpop.permute.xlu0 %1570 }
 0xa30   :  { %3053 = vmatpush3.msra.mxu1 %v1441_v62  ;;  %v1446_v7 = vpop.permute.xlu1 %1445 }
 0xa31   :  { %3054 = vmatprep.subr.mxu1 %v1440_v63 }
 0xa32   :  { %3055 = vmatpush3.msra.mxu1 %v1440_v63 }
 0xa33   :  { %3057 = vmatmul.mubr.msk.f32.vlgmr.msra.gmra.mxu1 %vm96_vm0, %v2736_v2  ;;  %v2740_v2 = vld [vmem:[%s4177_s7 + $0x28] sm:$0xff] }
 0xa34   :  { %3059 = vmatprep.mubr.msk.f32.mxu1 %vm96_vm0, %v2737_v5  ;;  %v1454_v23 = vpop.permute.xlu1 %1453  ;;  %v2741_v5 = vld [vmem:[%s4177_s7 + $0x30] sm:$0xff] }
 0xa37   :  { %3060 = vmatmul.mubr.msk.f32.gmra.mxu1 %vm96_vm0, %v2738_v6  ;;  %v3277_v6 = vld [vmem:[%s4174_s4 + $0x8] sm:$0xff] }
 0xa38   :  { %3086 = vmatprep.mubr.msk.f32.mxu1 %vm789_vm4, %v2739_v59 }
 0xa39   :  { %v1559_v25 = vpop.permute.xlu1 %1558 }
 0xa3e   :  { %v1458_v9 = vpop.permute.xlu1 %1457 }
 0xa43   :  { %v1567_v21 = vpop.permute.xlu1 %1566 }
 0xaf3   :  { %v3058_v8 = vpop.f32.mrf.mxu1 }
 0xaf4   :  { %v1544_v10 = vadd.f32 %v3058_v8, %v1450_v24  ;;  %v2743_v24 = vld [vmem:[%s4178_s8 + $0x20] sm:$0xff] }
 0xaf5   :  { %v1538_v11 = vpop.f32.mrf.mxu1 }
 0xaf6   :  { %v1539_v14 = vadd.f32 %v1538_v11, %v1446_v7  ;;  %v1574_v17 = vmul.f32 %v1563_v26, %v1544_v10  ;;  %v2742_v7 = vld [vmem:[%s4177_s7 + $0x38] sm:$0xff]  ;;  %v1709_v11 = vpop.permute.xlu0 %1708 }
 0xaf7   :  { %v3061_v15 = vpop.f32.mrf.mxu1 }
 0xaf8   :  { %v1573_v16 = vmul.f32 %v1559_v25, %v1539_v14  ;;  %v1554_v18 = vadd.f32 %v3061_v15, %v1458_v9  ;;  %v1578_v51 = vsel %vm421_vm3, %v1574_v17, 0.0  ;;  %v1713_v25 = vpop.permute.xlu1 %1712 }
 0xaf9   :  { %v1548_v20 = vpop.f32.mrf.mxu1 }
 0xafa   :  { %v1577_v30 = vsel %vm421_vm3, %v1573_v16, 0.0  ;;  %v1549_v31 = vadd.f32 %v1548_v20, %v1454_v23  ;;  %v1576_v33 = vmul.f32 %v1571_v12, %v1554_v18  ;;  %v3931_v23 = vld [vmem:[%s4174_s4] sm:$0xff]  ;;  %v2744_v20 = vld [vmem:[%s4178_s8 + $0x28] sm:$0xff] }
 0xafb   :  { %v1579_v3 = vadd.f32 %v1578_v51, %v1577_v30  ;;  %v2746_v30 = vld [vmem:[%s4178_s8 + $0x38] sm:$0xff] }
 0xafc   :  { %v1575_v1 = vmul.f32 %v1567_v21, %v1549_v31  ;;  %v1582_v50 = vsel %vm421_vm3, %v1576_v33, 0.0  ;;  %v1705_v8 = vpop.permute.xlu1 %1704  ;;  %v2745_v21 = vld [vmem:[%s4178_s8 + $0x30] sm:$0xff]  ;;  %v1927_v33 = vpop.permute.xlu0 %1926 }
 0xafe   :  { %v1580_v53 = vsel %vm421_vm3, %v1575_v1, 0.0 }
 0xaff   :  { %v1581_v4 = vadd.f32 %v1580_v53, %v1579_v3 }
 0xb00   :  { %v1701_v17 = vpop.permute.xlu1 %1700 }
 0xb01   :  { %v1583_v52 = vadd.f32 %v1582_v50, %v1581_v4  ;;  %v1915_v50 = vpop.permute.xlu0 %1914 }
 0xb03   :  { %v1584_v36 = vrot.slane %v1583_v52, 4 }
 0xb04   :  { %v1923_v51 = vpop.permute.xlu1 %1922 }
 0xb05   :  { %v1585_v39 = vadd.f32 %v1584_v36, %v1583_v52 }
 0xb07   :  { %v1586_v40 = vrot.slane %v1585_v39, 2 }
 0xb08   :  { %v1919_v3 = vpop.permute.xlu1 %1918 }
 0xb09   :  { %v1587_v13 = vadd.f32 %v1586_v40, %v1585_v39 }
 0xb0b   :  { %v1588_v41 = vrot.slane %v1587_v13, 1 }
 0xb0d   :  { %v1589_v35 = vadd.f32 %v1588_v41, %v1587_v13 }
 0xb0f   :  { %v1591_v46 = vadd.f32 %v1590_v44, %v1589_v35  ;;  %v1940_v35 = vld [vmem:[%s4180_s10 + $0x18] sm:$0xff] }
 0xb11   :  { %v2768_v38 = vmul.f32 -1.442695, %v1591_v46  ;;  %v1941_v46 = vld [vmem:[%s4180_s10 + $0x20] sm:$0xff] }
 0xb13   :  { %3257 = vpow2.f32 %v2768_v38  ;;  %v1942_v38 = vld [vmem:[%s4180_s10 + $0x28] sm:$0xff] }
 0xb20   :  { %v3258_v42 = vpop.eup %3257 }
 0xb21   :  { %v1595_v45 = vadd.f32 1.0, %v3258_v42  ;;  %v1943_v42 = vld [vmem:[%s4180_s10 + $0x30] sm:$0xff] }
 0xb23   :  { %3259 = vrcp.f32 %v1595_v45  ;;  %v1944_v45 = vld [vmem:[%s4180_s10 + $0x38] sm:$0xff] }
 0xb30   :  { %v3260_v47 = vpop.eup %3259 }
 0xb31   :  { %v1598_v48 = vmul.f32 %v3260_v47, %v1539_v14  ;;  %v1599_v56 = vmul.f32 %v3260_v47, %v1544_v10  ;;  %v1600_v57 = vmul.f32 %v3260_v47, %v1549_v31  ;;  %v1601_v49 = vmul.f32 %v3260_v47, %v1554_v18  ;;  %v1937_v31 = vld [vmem:[%s4180_s10] sm:$0xff] }
 0xb33   :  { %3064 = vmatprep.mubr.msk.f32.mxu0 %vm421_vm3, %v1598_v48 }
 0xb34   :  { %3065 = vmatmul.mubr.msk.f32.vlgmr.msra.gmra.mxu0 %vm421_vm3, %v1599_v56 }
 0xb35   :  { %3067 = vmatprep.mubr.msk.f32.mxu0 %vm421_vm3, %v1600_v57 }
 0xb38   :  { %3068 = vmatmul.mubr.msk.f32.gmra.mxu0 %vm421_vm3, %v1601_v49 }
 0xb39   :  { %3100 = vmatprep.mubr.msk.f32.mxu0 %vm96_vm0, %v2743_v24 }
 0xbf4   :  { %v3066_v60 = vpop.f32.mrf.mxu0 }
 0xbf6   :  { %v1680_v61 = vpop.f32.mrf.mxu0 }
 0xbf8   :  { %v3069_v62 = vpop.f32.mrf.mxu0 }
 0xbf9   :  { %3070 = vmatprep.subr.mxu1 %v3069_v62 }
 0xbfa   :  { %v1690_v63 = vpop.f32.mrf.mxu0  ;;  %3071 = vmatpush3.msra.mxu1 %v3069_v62  ;;  %v4010_v62 = vld [vmem:[%s4182_s12 + $0x10] sm:$0xff] }
 0xbfb   :  { %3072 = vmatprep.subr.mxu1 %v1690_v63 }
 0xbfc   :  { %3073 = vmatpush3.msra.mxu1 %v1690_v63  ;;  %v4016_v63 = vld [vmem:[%s4182_s12 + $0x18] sm:$0xff] }
 0xbfd   :  { %3074 = vmatprep.subr.mxu1 %v3066_v60 }
 0xbfe   :  { %3075 = vmatpush3.msra.mxu1 %v3066_v60 }
 0xbff   :  { %3076 = vmatprep.subr.mxu1 %v1680_v61 }
 0xc00   :  { %3077 = vmatpush3.msra.mxu1 %v1680_v61 }
 0xc01   :  { %3078 = vmatprep.subr.mxu1 %v3702_v22 }
 0xc02   :  { %3079 = vmatpush3.msra.mxu1 %v3702_v22 }
 0xc03   :  { %3080 = vmatprep.subr.mxu1 %v3706_v32 }
 0xc04   :  { %3081 = vmatpush3.msra.mxu1 %v3706_v32 }
 0xc05   :  { %3082 = vmatprep.subr.mxu1 %v3710_v34 }
 0xc06   :  { %3083 = vmatpush3.msra.mxu1 %v3710_v34 }
 0xc07   :  { %3084 = vmatprep.subr.mxu1 %v3714_v0 }
 0xc08   :  { %3085 = vmatpush3.msra.mxu1 %v3714_v0 }
 0xc09   :  { %3087 = vmatmul.mubr.msk.f32.vlgmr.msra.gmra.mxu1 %vm789_vm4, %v2740_v2  ;;  %3126 = vmatprep.subr.mxu1 %v3277_v6  ;;  %v4027_v2 = vld [vmem:[%s4182_s12 + $0x8] sm:$0xff] }
 0xc0a   :  { %3089 = vmatprep.mubr.msk.f32.mxu1 %vm789_vm4, %v2741_v5  ;;  %3127 = vmatpush3.msra.mxu1 %v3277_v6  ;;  %v4036_v5 = vld [vmem:[%s4182_s12] sm:$0xff] }
 0xc0b   :  { %3128 = vmatprep.subr.mxu1 %v3931_v23 }
 0xc0c   :  { %3129 = vmatpush3.msra.mxu1 %v3931_v23 }
 0xc0d   :  { %3090 = vmatmul.mubr.msk.f32.gmra.mxu1 %vm789_vm4, %v2742_v7 }
 0xcc9   :  { %v3088_v26 = vpop.f32.mrf.mxu1 }
 0xcca   :  { %v1799_v18 = vadd.f32 %v3088_v26, %v1705_v8 }
 0xccb   :  { %v1793_v9 = vpop.f32.mrf.mxu1 }
 0xccc   :  { %v1794_v12 = vadd.f32 %v1793_v9, %v1701_v17 }
 0xccd   :  { %v3091_v10 = vpop.f32.mrf.mxu1 }
 0xcce   :  { %v1809_v14 = vadd.f32 %v3091_v10, %v1713_v25 }
 0xccf   :  { %v1803_v15 = vpop.f32.mrf.mxu1 }
 0xcd0   :  { %v1804_v16 = vadd.f32 %v1803_v15, %v1709_v11  ;;  %3092 = vmatprep.subr.mxu0 %v1809_v14 }
 0xcd1   :  { %3093 = vmatpush3.msra.mxu0 %v1809_v14 }
 0xcd2   :  { %3094 = vmatprep.subr.mxu0 %v1804_v16 }
 0xcd3   :  { %3095 = vmatpush3.msra.mxu0 %v1804_v16 }
 0xcd4   :  { %3096 = vmatprep.subr.mxu0 %v1799_v18 }
 0xcd5   :  { %3097 = vmatpush3.msra.mxu0 %v1799_v18 }
 0xcd6   :  { %3098 = vmatprep.subr.mxu0 %v1794_v12 }
 0xcd7   :  { %3099 = vmatpush3.msra.mxu0 %v1794_v12  ;;  %v3279_v12 = vld [vmem:[%s4173_s3] ss:$0 sm:$0xff] }
 0xcd8   :  { %3101 = vmatmul.mubr.msk.f32.vlgmr.msra.gmra.mxu0 %vm96_vm0, %v2744_v20 }
 0xcd9   :  { %3103 = vmatprep.mubr.msk.f32.mxu0 %vm96_vm0, %v2745_v21 }
 0xcdc   :  { %3104 = vmatmul.mubr.msk.f32.gmra.mxu0 %vm96_vm0, %v2746_v30 }
 0xcdd   :  { %3114 = vmatprep.mubr.msk.f32.mxu0 %vm96_vm0, %v1937_v31 }
 0xd98   :  { %v3102_v1 = vpop.f32.mrf.mxu0 }
 0xd99   :  { %v1910_v53 = vadd.f32 %v3102_v1, %v3710_v34 }
 0xd9a   :  { %v1890_v4 = vpop.f32.mrf.mxu0 }
 0xd9b   :  { %v1930_v52 = vadd.f32 %v1919_v3, %v1910_v53  ;;  %v1909_v36 = vadd.f32 %v1890_v4, %v3714_v0 }
 0xd9c   :  { %v3105_v39 = vpop.f32.mrf.mxu0 }
 0xd9d   :  { %2673 = vst.msk [vmem:[%s4184_s14 + $0x8] sm:$0xff] %vm242_vm1, %v1930_v52  ;;  %v1912_v40 = vadd.f32 %v3105_v39, %v3702_v22  ;;  %v1929_v13 = vadd.f32 %v1915_v50, %v1909_v36  ;;  %v1938_v22 = vld [vmem:[%s4180_s10 + $0x8] sm:$0xff] }
 0xd9e   :  { %v1900_v41 = vpop.f32.mrf.mxu0 }
 0xd9f   :  { %v1932_v44 = vadd.f32 %v1927_v33, %v1912_v40  ;;  %2672 = vst.msk [vmem:[%s4184_s14] sm:$0xff] %vm242_vm1, %v1929_v13  ;;  %v1911_v34 = vadd.f32 %v1900_v41, %v3706_v32  ;;  %v1939_v32 = vld [vmem:[%s4180_s10 + $0x10] sm:$0xff] }
 0xda1   :  { %2675 = vst.msk [vmem:[%s4184_s14 + $0x18] sm:$0xff] %vm242_vm1, %v1932_v44  ;;  %v1931_v0 = vadd.f32 %v1923_v51, %v1911_v34  ;;  %3106 = vmatprep.subr.mxu0 %v1932_v44  ;;  %v3280_v51 = vld [vmem:[%s4173_s3 + $0x1] ss:$0 sm:$0xff] }
 0xda2   :  { %3107 = vmatpush3.msra.mxu0 %v1932_v44 }
 0xda3   :  { %2674 = vst.msk [vmem:[%s4184_s14 + $0x10] sm:$0xff] %vm242_vm1, %v1931_v0  ;;  %3108 = vmatprep.subr.mxu0 %v1931_v0 }
 0xda4   :  { %3109 = vmatpush3.msra.mxu0 %v1931_v0 }
 0xda5   :  { %3110 = vmatprep.subr.mxu0 %v1930_v52 }
 0xda6   :  { %3111 = vmatpush3.msra.mxu0 %v1930_v52 }
 0xda7   :  { %3112 = vmatprep.subr.mxu0 %v1929_v13 }
 0xda8   :  { %3113 = vmatpush3.msra.mxu0 %v1929_v13 }
 0xda9   :  { %3115 = vmatmul.mubr.msk.f32.vlgmr.msra.gmra.mxu0 %vm96_vm0, %v1938_v22 }
 0xdaa   :  { %3117 = vmatprep.mubr.msk.f32.mxu0 %vm96_vm0, %v1939_v32 }
 0xdad   :  { %3118 = vmatmul.mubr.msk.f32.gmra.mxu0 %vm96_vm0, %v1940_v35 }
 0xdae   :  { %3120 = vmatprep.mubr.msk.f32.mxu0 %vm96_vm0, %v1941_v46 }
 0xdb1   :  { %3121 = vmatmul.mubr.msk.f32.gmra.mxu0 %vm96_vm0, %v1942_v38 }
 0xdb2   :  { %3123 = vmatprep.mubr.msk.f32.mxu0 %vm96_vm0, %v1943_v42 }
 0xdb5   :  { %3124 = vmatmul.mubr.msk.f32.gmra.mxu0 %vm96_vm0, %v1944_v45 }
 0xe69   :  { %v3116_v47 = vpop.f32.mrf.mxu0 }
 0xe6b   :  { %v2035_v48 = vpop.f32.mrf.mxu0 }
 0xe6d   :  { %v3119_v56 = vpop.f32.mrf.mxu0 }
 0xe6f   :  { %v2045_v57 = vpop.f32.mrf.mxu0 }
 0xe71   :  { %v3122_v49 = vpop.f32.mrf.mxu0 }
 0xe72   :  { %2080 = vrot.lane.b32.xlu0 %v3122_v49, %s3319_s18 }
 0xe73   :  { %v2055_v59 = vpop.f32.mrf.mxu0 }
 0xe74   :  { %2078 = vrot.lane.b32.xlu1 %v2055_v59, %s3319_s18 }
 0xe75   :  { %v3125_v60 = vpop.f32.mrf.mxu0 }
 0xe76   :  { %2084 = vrot.lane.b32.xlu0 %v3125_v60, %s3319_s18 }
 0xe77   :  { %v2065_v61 = vpop.f32.mrf.mxu0 }
 0xe78   :  { %2082 = vrot.lane.b32.xlu1 %v2065_v61, %s3319_s18 }
 0xe7a   :  { %2106 = vperm.xlu0 %3212, %v4010_v62  }
 0xe7c   :  { %2111 = vperm.xlu1 %3211, %v4016_v63  }
 0xe7e   :  { %3215 = vset.pattern.permute.xlu0 %v3320_v27 }
 0xe7f   :  { %2224 = vperm.xlu0 %3215, %v4010_v62  }
 0xe80   :  { %3213 = vset.pattern.permute.xlu1 %v3320_v27 }
 0xe81   :  { %2228 = vperm.xlu1 %3213, %v4016_v63  }
 0xe83   :  { %3217 = vset.pattern.permute.xlu0 %v3321_v28 }
 0xe84   :  { %2252 = vperm.xlu0 %3217, %v4016_v63  }
 0xe85   :  { %3214 = vset.pattern.permute.xlu1 %v3318_v19 }
 0xe86   :  { %2101 = vperm.xlu1 %3214, %v4027_v2  }
 0xe88   :  { %2244 = vperm.xlu0 %3217, %v4027_v2  }
 0xe8a   :  { %2096 = vperm.xlu1 %3214, %v4036_v5  }
 0xe8c   :  { %3220 = vset.pattern.permute.xlu0 %v3322_v37 }
 0xe8e   :  { %3216 = vset.pattern.permute.xlu1 %v3320_v27 }
 0xe8f   :  { %2220 = vperm.xlu1 %3216, %v4027_v2  }
 0xe93   :  { %2216 = vperm.xlu1 %3216, %v4036_v5  }
 0xe97   :  { %3218 = vset.pattern.permute.xlu1 %v3321_v28 }
 0xe98   :  { %2248 = vperm.xlu1 %3218, %v4010_v62  }
 0xe9c   :  { %2240 = vperm.xlu1 %3218, %v4036_v5  }
 0xea0   :  { %3219 = vset.pattern.permute.xlu1 %v3322_v37 }
 0xee4   :  { %v2081_v19 = vpop.permute.xlu0 %2080 }
 0xee5   :  { %v2091_v24 = vsel %vm242_vm1, %v3116_v47, %v2081_v19 }
 0xee6   :  { %v2079_v6 = vpop.permute.xlu1 %2078 }
 0xee7   :  { %v2090_v7 = vsel %vm242_vm1, %v2035_v48, %v2079_v6 }
 0xee8   :  { %3130 = vmatprep.mubr.msk.f32.mxu1 %vm275_vm2, %v2090_v7  ;;  %v2085_v27 = vpop.permute.xlu0 %2084 }
 0xee9   :  { %3131 = vmatmul.mubr.msk.f32.vlgmr.msra.gmra.mxu1 %vm275_vm2, %v2091_v24  ;;  %v2093_v26 = vsel %vm242_vm1, %v3119_v56, %v2085_v27 }
 0xeea   :  { %v2083_v25 = vpop.permute.xlu1 %2082 }
 0xeeb   :  { %v2092_v28 = vsel %vm242_vm1, %v2045_v57, %v2083_v25 }
 0xeec   :  { %3133 = vmatprep.mubr.msk.f32.mxu1 %vm275_vm2, %v2092_v28 }
 0xeed   :  { %3134 = vmatmul.mubr.msk.f32.gmra.mxu1 %vm275_vm2, %v2093_v26 }
 0xef5   :  { %v2107_v14 = vpop.permute.xlu0 %2106 }
 0xef6   :  { %v2116_v50 = vmul.f32 %v3279_v12, %v2107_v14 }
 0xef7   :  { %v2112_v8 = vpop.permute.xlu1 %2111 }
 0xef8   :  { %v2117_v31 = vmul.f32 %v3279_v12, %v2112_v8 }
 0xefa   :  { %v2225_v16 = vpop.permute.xlu0 %2224 }
 0xefb   :  { %v2233_v36 = vmul.f32 %v3280_v51, %v2225_v16 }
 0xefc   :  { %v2229_v9 = vpop.permute.xlu1 %2228 }
 0xefd   :  { %v2234_v53 = vmul.f32 %v3280_v51, %v2229_v9 }
 0xeff   :  { %v2253_v21 = vpop.permute.xlu0 %2252 }
 0xf01   :  { %v2102_v10 = vpop.permute.xlu1 %2101 }
 0xf02   :  { %v2115_v20 = vmul.f32 %v3279_v12, %v2102_v10 }
 0xf03   :  { %v2245_v22 = vpop.permute.xlu0 %2244 }
 0xf05   :  { %v2097_v11 = vpop.permute.xlu1 %2096 }
 0xf06   :  { %v2114_v4 = vmul.f32 %v3279_v12, %v2097_v11  ;;  %v2351_v12 = vld [vmem:[%s4181_s11] sm:$0xff] }
 0xf07   :  { %3144 = vmatprep.mubr.msk.f32.mxu1 %vm96_vm0, %v2351_v12 }
 0xf0a   :  { %v2221_v15 = vpop.permute.xlu1 %2220 }
 0xf0b   :  { %v2232_v33 = vmul.f32 %v3280_v51, %v2221_v15 }
 0xf0e   :  { %v2217_v17 = vpop.permute.xlu1 %2216 }
 0xf0f   :  { %v2231_v39 = vmul.f32 %v3280_v51, %v2217_v17 }
 0xf13   :  { %v2249_v40 = vpop.permute.xlu1 %2248 }
 0xf17   :  { %v2241_v47 = vpop.permute.xlu1 %2240 }
 0xfa9   :  { %v3132_v18 = vpop.f32.mrf.mxu1 }
 0xfaa   :  { %v2202_v1 = vadd.f32 %v3132_v18, %v2115_v20 }
 0xfab   :  { %v2196_v30 = vpop.f32.mrf.mxu1 }
 0xfac   :  { %v2197_v41 = vadd.f32 %v2196_v30, %v2114_v4  ;;  %v2236_v44 = vadd.f32 %v2232_v33, %v2202_v1 }
 0xfad   :  { %v3135_v3 = vpop.f32.mrf.mxu1 }
 0xfae   :  { %v2212_v52 = vadd.f32 %v3135_v3, %v2117_v31  ;;  %v2256_v46 = vadd.f32 %v2245_v22, %v2236_v44  ;;  %v2235_v38 = vadd.f32 %v2231_v39, %v2197_v41 }
 0xfaf   :  { %v2206_v13 = vpop.f32.mrf.mxu1 }
 0xfb0   :  { %v2238_v34 = vadd.f32 %v2234_v53, %v2212_v52  ;;  %v2207_v0 = vadd.f32 %v2206_v13, %v2116_v50  ;;  %v2255_v56 = vadd.f32 %v2241_v47, %v2235_v38  ;;  %v2262_v57 = vsel %vm421_vm3, %v2256_v46, 0.0 }
 0xfb2   :  { %v2237_v32 = vadd.f32 %v2233_v36, %v2207_v0  ;;  %v2258_v35 = vadd.f32 %v2253_v21, %v2238_v34  ;;  %v2259_v49 = vsel %vm421_vm3, %v2255_v56, 0.0 }
 0xfb4   :  { %v2268_v42 = vsel %vm421_vm3, %v2258_v35, 0.0  ;;  %v2257_v45 = vadd.f32 %v2249_v40, %v2237_v32 }
 0xfb5   :  { %2269 = vadd.xlane.f32.xlu0 %v2268_v42 }
 0xfb6   :  { %v2265_v48 = vsel %vm421_vm3, %v2257_v45, 0.0 }
 0xfb7   :  { %2266 = vadd.xlane.f32.xlu1 %v2265_v48 }
 0xfb9   :  { %2263 = vadd.xlane.f32.xlu0 %v2262_v57 }
 0xfbd   :  { %2260 = vadd.xlane.f32.xlu0 %v2259_v49 }
 0xfc8   :  { %2324 = vperm.xlu1 %3219, %v4016_v63  }
 0xfcc   :  { %3221 = vset.pattern.permute.xlu1 %v3323_v29 }
0x103e   :  { %v2270_v59 = vpop.xlane.xlu0 %2269 }
0x103f   :  { %v2274_v60 = vmul.f32 0.017857144, %v2270_v59 }
0x1040   :  { %v2267_v61 = vpop.xlane.xlu1 %2266 }
0x1041   :  { %v4068_v7 = vsub.f32 %v2258_v35, %v2274_v60  ;;  %v2273_v24 = vmul.f32 0.017857144, %v2267_v61  ;;  %v2352_v60 = vld [vmem:[%s4181_s11 + $0x8] sm:$0xff]  ;;  %v2353_v61 = vld [vmem:[%s4181_s11 + $0x10] sm:$0xff] }
0x1042   :  { %v2264_v19 = vpop.xlane.xlu0 %2263 }
0x1043   :  { %v2272_v6 = vmul.f32 0.017857144, %v2264_v19  ;;  %v4074_v8 = vsub.f32 %v2257_v45, %v2273_v24  ;;  %v2282_v11 = vmul.f32 %v4068_v7, %v4068_v7  ;;  %v2354_v19 = vld [vmem:[%s4181_s11 + $0x18] sm:$0xff] }
0x1045   :  { %v4070_v27 = vsub.f32 %v2256_v46, %v2272_v6  ;;  %v2292_v15 = vsel %vm421_vm3, %v2282_v11, 0.0  ;;  %v2281_v17 = vmul.f32 %v4074_v8, %v4074_v8 }
0x1046   :  { %v2261_v25 = vpop.xlane.xlu0 %2260 }
0x1047   :  { %v2271_v28 = vmul.f32 0.017857144, %v2261_v25  ;;  %v2280_v26 = vmul.f32 %v4070_v27, %v4070_v27  ;;  %v2289_v18 = vsel %vm421_vm3, %v2281_v17, 0.0 }
0x1049   :  { %v4076_v9 = vsub.f32 %v2255_v56, %v2271_v28  ;;  %v2286_v10 = vsel %vm421_vm3, %v2280_v26, 0.0 }
0x104a   :  { %2287 = vadd.xlane.f32.xlu1 %v2286_v10 }
0x104b   :  { %v2279_v14 = vmul.f32 %v4076_v9, %v4076_v9 }
0x104d   :  { %v2283_v16 = vsel %vm421_vm3, %v2279_v14, 0.0 }
0x104e   :  { %2293 = vadd.xlane.f32.xlu1 %v2292_v15  ;;  %2284 = vadd.xlane.f32.xlu0 %v2283_v16 }
0x1052   :  { %2290 = vadd.xlane.f32.xlu0 %v2289_v18 }
0x105f   :  { %2344 = vperm.xlu1 %3221, %v4016_v63  }
0x1063   :  { %3222 = vset.pattern.permute.xlu1 %v3322_v37 }
0x1064   :  { %2316 = vperm.xlu1 %3222, %v4027_v2  }
0x1068   :  { %3223 = vset.pattern.permute.xlu1 %v3323_v29  ;;  %2320 = vperm.xlu0 %3220, %v4010_v62  }
0x1069   :  { %2340 = vperm.xlu1 %3223, %v4010_v62  }
0x106c   :  { %3227 = vset.pattern.permute.xlu0 %v3324_v54 }
0x106d   :  { %3224 = vset.pattern.permute.xlu1 %v3322_v37  ;;  %2364 = vperm.xlu0 %3227, %v4010_v62   ;;  %v2325_v37 = vpop.permute.xlu1 %2324 }
0x106e   :  { %2312 = vperm.xlu1 %3224, %v4036_v5  }
0x1071   :  { %3228 = vset.pattern.permute.xlu0 %v3326_v43 }
0x1072   :  { %3225 = vset.pattern.permute.xlu1 %v3323_v29 }
0x1073   :  { %2336 = vperm.xlu1 %3225, %v4027_v2  }
0x1077   :  { %2332 = vperm.xlu1 %3225, %v4036_v5  }
0x107b   :  { %3226 = vset.pattern.permute.xlu1 %v3324_v54 }
0x107c   :  { %2356 = vperm.xlu1 %3226, %v4036_v5  }
0x1080   :  { %2360 = vperm.xlu1 %3226, %v4027_v2  }
0x1084   :  { %2368 = vperm.xlu1 %3226, %v4016_v63  }
0x1088   :  { %3229 = vset.pattern.permute.xlu1 %v3326_v43 }
0x10d3   :  { %v2288_v29 = vpop.xlane.xlu1 %2287 }
0x10d4   :  { %v2296_v20 = vmul.f32 0.017857144, %v2288_v29 }
0x10d6   :  { %v2300_v33 = vadd.f32 1e-05, %v2296_v20 }
0x10d7   :  { %v2285_v21 = vpop.xlane.xlu0 %2284  ;;  %v2294_v30 = vpop.xlane.xlu1 %2293 }
0x10d8   :  { %v2295_v31 = vmul.f32 0.017857144, %v2285_v21  ;;  %v2298_v51 = vmul.f32 0.017857144, %v2294_v30 }
0x10da   :  { %v2302_v1 = vadd.f32 1e-05, %v2298_v51  ;;  %v2299_v3 = vadd.f32 1e-05, %v2295_v31 }
0x10db   :  { %v2291_v53 = vpop.xlane.xlu0 %2290  ;;  %v2345_v54 = vpop.permute.xlu1 %2344 }
0x10dc   :  { %v2297_v4 = vmul.f32 0.017857144, %v2291_v53  ;;  %3261 = vrsqrt.f32 %v2302_v1 }
0x10dd   :  { %3263 = vrsqrt.f32 %v2300_v33 }
0x10de   :  { %v2301_v50 = vadd.f32 1e-05, %v2297_v4  ;;  %3265 = vrsqrt.f32 %v2299_v3 }
0x10df   :  { %v2317_v52 = vpop.permute.xlu1 %2316 }
0x10e0   :  { %3267 = vrsqrt.f32 %v2301_v50 }
0x10e3   :  { %v2321_v22 = vpop.permute.xlu0 %2320 }
0x10e4   :  { %v2341_v36 = vpop.permute.xlu1 %2340 }
0x10e8   :  { %v2365_v10 = vpop.permute.xlu0 %2364 }
0x10e9   :  { %v2313_v39 = vpop.permute.xlu1 %2312  ;;  %v3262_v40 = vpop.eup %3261 }
0x10ea   :  { %v3264_v13 = vpop.eup %3263  ;;  %v2310_v41 = vmul.f32 %v3262_v40, %v4068_v7 }
0x10eb   :  { %v3266_v44 = vpop.eup %3265  ;;  %v2308_v32 = vmul.f32 %v3264_v13, %v4070_v27 }
0x10ec   :  { %v2330_v0 = vmul.f32 %v2325_v37, %v2310_v41  ;;  %v2307_v42 = vmul.f32 %v3266_v44, %v4076_v9 }
0x10ed   :  { %v3268_v34 = vpop.eup %3267  ;;  %v2328_v47 = vmul.f32 %v2317_v52, %v2308_v32 }
0x10ee   :  { %v2337_v35 = vpop.permute.xlu1 %2336  ;;  %v2309_v46 = vmul.f32 %v3268_v34, %v4074_v8  ;;  %v2350_v38 = vadd.f32 %v2345_v54, %v2330_v0  ;;  %v2327_v57 = vmul.f32 %v2313_v39, %v2307_v42  ;;  %v3328_v39 = vmov 0.0  }
0x10ef   :  { %v2348_v49 = vadd.f32 %v2337_v35, %v2328_v47  ;;  %3150 = vmatprep.subr.mxu0 %v3328_v39  ;;  %3152 = vmatprep.mubr.msk.f32.mxu0 %vm3329_vm5, %v3328_v39 }
0x10f0   :  { %v2329_v45 = vmul.f32 %v2321_v22, %v2309_v46  ;;  %3136 = vmatprep.subr.mxu1 %v2350_v38  ;;  %3151 = vmatpush3.xpose.msk.msra.mxu0 %vm421_vm3, %v3931_v23 }
0x10f1   :  { %3137 = vmatpush3.msra.mxu1 %v2350_v38 }
0x10f2   :  { %v2349_v48 = vadd.f32 %v2341_v36, %v2329_v45  ;;  %v2333_v56 = vpop.permute.xlu1 %2332 }
0x10f3   :  { %v2347_v59 = vadd.f32 %v2333_v56, %v2327_v57 }
0x10f4   :  { %3138 = vmatprep.subr.mxu1 %v2349_v48 }
0x10f5   :  { %3139 = vmatpush3.msra.mxu1 %v2349_v48 }
0x10f6   :  { %3140 = vmatprep.subr.mxu1 %v2348_v49 }
0x10f7   :  { %3141 = vmatpush3.msra.mxu1 %v2348_v49  ;;  %v2357_v6 = vpop.permute.xlu1 %2356 }
0x10f8   :  { %3142 = vmatprep.subr.mxu1 %v2347_v59 }
0x10f9   :  { %3143 = vmatpush3.msra.mxu1 %v2347_v59 }
0x10fa   :  { %3145 = vmatmul.mubr.msk.f32.vlgmr.msra.gmra.mxu1 %vm96_vm0, %v2352_v60 }
0x10fb   :  { %3147 = vmatprep.mubr.msk.f32.mxu1 %vm96_vm0, %v2353_v61  ;;  %v2361_v7 = vpop.permute.xlu1 %2360 }
0x10fe   :  { %3148 = vmatmul.mubr.msk.f32.gmra.mxu1 %vm96_vm0, %v2354_v19 }
0x10ff   :  { %v2369_v28 = vpop.permute.xlu1 %2368 }
0x11ba   :  { %v3146_v24 = vpop.f32.mrf.mxu1 }
0x11bb   :  { %v2455_v27 = vadd.f32 %v3146_v24, %v2361_v7 }
0x11bc   :  { %v2449_v25 = vpop.f32.mrf.mxu1 }
0x11bd   :  { %v2450_v26 = vadd.f32 %v2449_v25, %v2357_v6  ;;  %v2471_v8 = vsel %vm421_vm3, %v2455_v27, 0.0 }
0x11be   :  { %v3149_v9 = vpop.f32.mrf.mxu1  ;;  %2472 = vadd.xlane.f32.xlu0 %v2471_v8 }
0x11bf   :  { %v2465_v11 = vadd.f32 %v3149_v9, %v2369_v28  ;;  %v2468_v14 = vsel %vm421_vm3, %v2450_v26, 0.0 }
0x11c0   :  { %v2459_v15 = vpop.f32.mrf.mxu1  ;;  %2469 = vadd.xlane.f32.xlu1 %v2468_v14 }
0x11c1   :  { %v2460_v16 = vadd.f32 %v2459_v15, %v2365_v10  ;;  %v2477_v18 = vsel %vm421_vm3, %v2465_v11, 0.0 }
0x11c3   :  { %v2474_v17 = vsel %vm421_vm3, %v2460_v16, 0.0 }
0x11c4   :  { %2475 = vadd.xlane.f32.xlu0 %v2474_v17  ;;  %2478 = vadd.xlane.f32.xlu1 %v2477_v18 }
0x11d5   :  { %2525 = vperm.xlu1 %3229, %v4027_v2  }
0x11d9   :  { %2529 = vperm.xlu1 %3229, %v4010_v62  }
0x11da   :  { %2521 = vperm.xlu0 %3228, %v4036_v5  }
0x11dd   :  { %3230 = vset.pattern.permute.xlu1 %v3327_v58 }
0x11de   :  { %2541 = vperm.xlu1 %3230, %v4036_v5   ;;  %3234 = vset.pattern.permute.xlu0 %v3325_v55 }
0x11e2   :  { %2545 = vperm.xlu1 %3230, %v4027_v2  }
0x11e6   :  { %3231 = vset.pattern.permute.xlu1 %v3326_v43 }
0x11e7   :  { %2533 = vperm.xlu1 %3231, %v4016_v63  }
0x11eb   :  { %3232 = vset.pattern.permute.xlu1 %v3327_v58 }
0x11ec   :  { %2549 = vperm.xlu1 %3232, %v4010_v62  }
0x11f0   :  { %3233 = vset.pattern.permute.xlu1 %v3325_v55 }
0x11f1   :  { %2561 = vperm.xlu1 %3233, %v4036_v5  }
0x11f5   :  { %3235 = vset.pattern.permute.xlu1 %v3327_v58 }
0x1247   :  { %v2473_v12 = vpop.xlane.xlu0 %2472 }
0x1248   :  { %v2481_v37 = vmul.f32 0.017857144, %v2473_v12 }
0x1249   :  { %v2470_v29 = vpop.xlane.xlu1 %2469 }
0x124a   :  { %v2485_v20 = vsub.f32 %v2455_v27, %v2481_v37  ;;  %v2480_v21 = vmul.f32 0.017857144, %v2470_v29 }
0x124c   :  { %v2484_v30 = vsub.f32 %v2450_v26, %v2480_v21  ;;  %v2489_v31 = vmul.f32 %v2485_v20, %v2485_v20 }
0x124d   :  { %v2476_v43 = vpop.xlane.xlu0 %2475  ;;  %v2479_v51 = vpop.xlane.xlu1 %2478 }
0x124e   :  { %v2482_v33 = vmul.f32 0.017857144, %v2476_v43  ;;  %v2483_v1 = vmul.f32 0.017857144, %v2479_v51  ;;  %v2495_v3 = vsel %vm421_vm3, %v2489_v31, 0.0  ;;  %v2488_v53 = vmul.f32 %v2484_v30, %v2484_v30 }
0x124f   :  { %2496 = vadd.xlane.f32.xlu1 %v2495_v3 }
0x1250   :  { %v2486_v54 = vsub.f32 %v2460_v16, %v2482_v33  ;;  %v2487_v4 = vsub.f32 %v2465_v11, %v2483_v1  ;;  %v2492_v5 = vsel %vm421_vm3, %v2488_v53, 0.0 }
0x1251   :  { %2493 = vadd.xlane.f32.xlu0 %v2492_v5  ;;  %v2526_v40 = vpop.permute.xlu1 %2525 }
0x1252   :  { %v2490_v58 = vmul.f32 %v2486_v54, %v2486_v54  ;;  %v2491_v50 = vmul.f32 %v2487_v4, %v2487_v4 }
0x1254   :  { %v2498_v52 = vsel %vm421_vm3, %v2490_v58, 0.0  ;;  %v2501_v36 = vsel %vm421_vm3, %v2491_v50, 0.0  ;;  %v2595_v58 = vld [vmem:[%s4171_s1] sm:$0x7] }
0x1255   :  { %2499 = vadd.xlane.f32.xlu0 %v2498_v52  ;;  %2502 = vadd.xlane.f32.xlu1 %v2501_v36  ;;  %v2530_v13 = vpop.permute.xlu1 %2529  ;;  %v2522_v22 = vpop.permute.xlu0 %2521 }
0x1259   :  { %v2542_v41 = vpop.permute.xlu1 %2541 }
0x125d   :  { %v2546_v44 = vpop.permute.xlu1 %2545 }
0x1262   :  { %v2534_v34 = vpop.permute.xlu1 %2533 }
0x1266   :  { %2553 = vperm.xlu1 %3235, %v4016_v63  }
0x1267   :  { %v2550_v0 = vpop.permute.xlu1 %2549 }
0x126a   :  { %3236 = vset.pattern.permute.xlu1 %v3325_v55 }
0x126b   :  { %2565 = vperm.xlu0 %3234, %v4027_v2   ;;  %2569 = vperm.xlu1 %3236, %v4010_v62  }
0x126c   :  { %v2562_v55 = vpop.permute.xlu1 %2561 }
0x126f   :  { %2573 = vperm.xlu0 %3234, %v4016_v63  }
0x12d8   :  { %v2497_v2 = vpop.xlane.xlu1 %2496 }
0x12d9   :  { %v2505_v32 = vmul.f32 0.017857144, %v2497_v2 }
0x12da   :  { %v2494_v62 = vpop.xlane.xlu0 %2493 }
0x12db   :  { %v2509_v35 = vadd.f32 1e-05, %v2505_v32  ;;  %v2504_v63 = vmul.f32 0.017857144, %v2494_v62 }
0x12dd   :  { %3269 = vrsqrt.f32 %v2509_v35  ;;  %v2508_v46 = vadd.f32 1e-05, %v2504_v63 }
0x12de   :  { %v2500_v38 = vpop.xlane.xlu0 %2499  ;;  %v2503_v42 = vpop.xlane.xlu1 %2502 }
0x12df   :  { %3271 = vrsqrt.f32 %v2508_v46  ;;  %v2506_v23 = vmul.f32 0.017857144, %v2500_v38  ;;  %v2507_v45 = vmul.f32 0.017857144, %v2503_v42 }
0x12e1   :  { %v2510_v47 = vadd.f32 1e-05, %v2506_v23  ;;  %v2511_v48 = vadd.f32 1e-05, %v2507_v45 }
0x12e2   :  { %v2554_v61 = vpop.permute.xlu1 %2553 }
0x12e3   :  { %3273 = vrsqrt.f32 %v2510_v47 }
0x12e4   :  { %3275 = vrsqrt.f32 %v2511_v48 }
0x12e6   :  { %v2566_v24 = vpop.permute.xlu0 %2565  ;;  %v2570_v14 = vpop.permute.xlu1 %2569 }
0x12ea   :  { %v3270_v56 = vpop.eup %3269  ;;  %v2574_v12 = vpop.permute.xlu0 %2573 }
0x12eb   :  { %v2517_v57 = vmul.f32 %v3270_v56, %v2485_v20 }
0x12ec   :  { %v3272_v49 = vpop.eup %3271 }
0x12ed   :  { %v2516_v59 = vmul.f32 %v3272_v49, %v2484_v30  ;;  %v2537_v60 = vmul.f32 %v2526_v40, %v2517_v57 }
0x12ef   :  { %v2536_v19 = vmul.f32 %v2522_v22, %v2516_v59  ;;  %v2557_v6 = vadd.f32 %v2546_v44, %v2537_v60 }
0x12f0   :  { %v3274_v7 = vpop.eup %3273 }
0x12f1   :  { %v3276_v27 = vpop.eup %3275  ;;  %v2556_v25 = vadd.f32 %v2542_v41, %v2536_v19  ;;  %v2518_v28 = vmul.f32 %v3274_v7, %v2486_v54  ;;  %v2577_v9 = vmul.f32 %v2566_v24, %v2557_v6  ;;  %v2593_v54 = vld [vmem:[%s4172_s2] sm:$0x7] }
0x12f2   :  { %v2519_v26 = vmul.f32 %v3276_v27, %v2487_v4 }
0x12f3   :  { %v2576_v8 = vmul.f32 %v2562_v55, %v2556_v25  ;;  %v2538_v10 = vmul.f32 %v2530_v13, %v2518_v28  ;;  %v2581_v18 = vsel %vm421_vm3, %v2577_v9, 0.0 }
0x12f4   :  { %v2539_v11 = vmul.f32 %v2534_v34, %v2519_v26 }
0x12f5   :  { %v2580_v15 = vsel %vm421_vm3, %v2576_v8, 0.0  ;;  %v2558_v16 = vadd.f32 %v2550_v0, %v2538_v10 }
0x12f6   :  { %v2559_v17 = vadd.f32 %v2554_v61, %v2539_v11  ;;  %v2582_v29 = vadd.f32 %v2581_v18, %v2580_v15 }
0x12f7   :  { %v2578_v37 = vmul.f32 %v2570_v14, %v2558_v16 }
0x12f8   :  { %v2579_v20 = vmul.f32 %v2574_v12, %v2559_v17 }
0x12f9   :  { %v2583_v21 = vsel %vm421_vm3, %v2578_v37, 0.0 }
0x12fa   :  { %v2584_v30 = vadd.f32 %v2583_v21, %v2582_v29  ;;  %v2585_v31 = vsel %vm421_vm3, %v2579_v20, 0.0 }
0x12fc   :  { %v2586_v43 = vadd.f32 %v2585_v31, %v2584_v30 }
0x12fe   :  { %v2587_v51 = vrot.slane %v2586_v43, 4 }
0x1300   :  { %v2588_v33 = vadd.f32 %v2587_v51, %v2586_v43 }
0x1302   :  { %v2589_v1 = vrot.slane %v2588_v33, 2 }
0x1304   :  { %v2590_v3 = vadd.f32 %v2589_v1, %v2588_v33 }
0x1306   :  { %v2591_v53 = vrot.slane %v2590_v3, 1 }
0x1308   :  { %v2592_v4 = vadd.f32 %v2591_v53, %v2590_v3 }
0x130a   :  { %v2594_v5 = vmul.f32 %v2593_v54, %v2592_v4 }
0x130c   :  { %3153 = vmatmul.mubr.msk.f32.vlgmr.msra.gmra.mxu0 %vm421_vm3, %v2594_v5 }
0x13cc   :  { %v2665_v50 = vpop.f32.mrf.mxu0 }
0x13cd   :  { %v2669_v52 = vadd.f32 %v2665_v50, %v2595_v58 }
0x13ce   :  { %v3154_v36 = vpop.f32.mrf.mxu0 }
0x13cf   :  { %2671 = vst.msk [vmem:[#allocation5] sm:$0x7] %vm2670_vm6, %v2669_v52 }
0x13d0   :  { %3304 = shalt.err (!%p3301_p9)
}
0x13d1   :  { %2687 = dma.vmem_to_hbm [thread:$0]  %s2685_s20, 64, %s4185_s15, [#allocation3]  }
0x13d2   :  { %3315 = dma.done.wait [#allocation3], 64  }
0x13d3   :  { %3316 = vsyncadd [#allocation3], 4294967232 }
0x13d4   :  { %2693 = vsyncpa [#allocation3], 1 }
0x13d5   :  { %2694 = vsyncpa [#allocation4], 1 }

</bundles_post_ra>
